<compile_context>
chip_gen: v5e
topology: v5e:2x2
jax: 0.10.0
libtpu: 0.0.40
codegen_flags: <defaults>
</compile_context>

<pallas_src>
import functools
import numpy as np

import jax
import jax.numpy as jnp
from jax import lax
from jax.experimental import pallas as pl
from jax.experimental.pallas import tpu as pltpu


# ----------------------------- Pallas kernel --------------------------------

def _pixelcnn_kernel(x_ref, w1_ref, b1_ref, wh_ref, bh_ref, wo_ref, bo_ref,
                     o_ref, a0_scr, ah_scr, *,
                     NB, H, W, Cin, Chid, K_in, K_hid, n_layers):
    """Fused PixelCNN forward for one batch chunk of NB images.

    x_ref  : (NB*H, W*Cin)                 bf16 input rows (lane-dense)
    w1_ref : (T1*W*Cin, W*Chid)            bf16 stacked masked 7x7 'A' weights
    b1_ref : (1, W*Chid)                   f32
    wh_ref : (n_layers, Th*W*Chid, W*Chid) bf16 stacked masked 3x3 'B' weights
    bh_ref : (n_layers, 1, W*Chid)         f32
    wo_ref : (W*Chid, W*Cout_pad)          bf16 block-diag 1x1 head weights
    bo_ref : (1, W*Cout_pad)               f32
    o_ref  : (NB*H, W*Cout_pad)            f32 output rows (lane-dense)
    a0_scr : (NB*H, T1*W*Cin)              bf16 scratch: layer-0 stacked-tap slab
    ah_scr : (NB*H, Th*W*Chid)             bf16 scratch: hidden stacked-tap slab
    """
    pad1, padh = K_in // 2, K_hid // 2
    T1, Th = pad1 + 1, padh + 1          # surviving kh taps (mask kills kh>pad)
    wc_in, wc_h = W * Cin, W * Chid

    # ---- layer 0: masked 7x7 'A' conv, Cin -> Chid --------------------------
    # Slab column block t holds the image rows shifted down by (pad1 - t);
    # the (pad1 - t) leading rows per image stay zero (top 'same' padding).
    a0_scr[...] = jnp.zeros_like(a0_scr)
    for n in range(NB):
        for t in range(T1):
            shift = pad1 - t
            a0_scr[n * H + shift:(n + 1) * H, t * wc_in:(t + 1) * wc_in] = (
                x_ref[n * H:(n + 1) * H - shift, :])
    h = jnp.dot(a0_scr[...], w1_ref[...], preferred_element_type=jnp.float32)
    h = jnp.maximum(h + b1_ref[...], 0.0)                 # (NB*H, W*Chid) f32

    # ---- n_layers masked 3x3 'B' convs, Chid -> Chid ------------------------
    # Zero rows (top padding) are written once and never overwritten.
    ah_scr[...] = jnp.zeros_like(ah_scr)
    for l in range(n_layers):
        hb = h.astype(jnp.bfloat16)
        for n in range(NB):
            for t in range(Th):
                shift = padh - t
                ah_scr[n * H + shift:(n + 1) * H, t * wc_h:(t + 1) * wc_h] = (
                    hb[n * H:(n + 1) * H - shift, :])
        acc = jnp.dot(ah_scr[...], wh_ref[l],
                      preferred_element_type=jnp.float32)
        h = jnp.maximum(acc + bh_ref[l], 0.0)             # (NB*H, W*Chid) f32

    # ---- 1x1 head: Chid -> Cout (block-diag over W, Cout zero-padded) -------
    y = jnp.dot(h.astype(jnp.bfloat16), wo_ref[...],
                preferred_element_type=jnp.float32)
    o_ref[...] = jnp.maximum(y + bo_ref[...], 0.0)        # lane-dense store


@functools.partial(jax.jit, static_argnames=(
    "N", "H", "W", "Cin", "Chid", "Cout_pad", "K_in", "K_hid", "n_layers"))
def _fused_forward(x_rows, w1, b1, wh, bh, wo, bo, *,
                   N, H, W, Cin, Chid, Cout_pad, K_in, K_hid, n_layers):
    T1, Th = K_in // 2 + 1, K_hid // 2 + 1

    # Fold the (small) batch into the matmul M dimension; chunk large batches.
    NB = 1
    for cand in (16, 8, 4, 2, 1):
        if N % cand == 0:
            NB = cand
            break
    n_steps = N // NB
    M = NB * H

    kern = functools.partial(_pixelcnn_kernel, NB=NB, H=H, W=W, Cin=Cin,
                             Chid=Chid, K_in=K_in, K_hid=K_hid,
                             n_layers=n_layers)

    flops = 2 * N * H * (T1 * W * Cin * W * Chid
                         + n_layers * Th * W * Chid * W * Chid
                         + W * Chid * W * Cout_pad)

    def _nbytes(a):
        return int(a.size) * a.dtype.itemsize

    bytes_accessed = (_nbytes(x_rows) + _nbytes(w1) + _nbytes(b1) + _nbytes(wh)
                      + _nbytes(bh) + _nbytes(wo) + _nbytes(bo)
                      + N * H * W * Cout_pad * 4)

    return pl.pallas_call(
        kern,
        out_shape=jax.ShapeDtypeStruct((N * H, W * Cout_pad), jnp.float32),
        grid_spec=pltpu.PrefetchScalarGridSpec(
            num_scalar_prefetch=0,
            grid=(n_steps,),
            in_specs=[
                pl.BlockSpec((M, W * Cin), lambda i: (i, 0)),
                pl.BlockSpec((T1 * W * Cin, W * Chid), lambda i: (0, 0)),
                pl.BlockSpec((1, W * Chid), lambda i: (0, 0)),
                pl.BlockSpec((n_layers, Th * W * Chid, W * Chid),
                             lambda i: (0, 0, 0)),
                pl.BlockSpec((n_layers, 1, W * Chid), lambda i: (0, 0, 0)),
                pl.BlockSpec((W * Chid, W * Cout_pad), lambda i: (0, 0)),
                pl.BlockSpec((1, W * Cout_pad), lambda i: (0, 0)),
            ],
            out_specs=pl.BlockSpec((M, W * Cout_pad), lambda i: (i, 0)),
            scratch_shapes=[
                pltpu.VMEM((M, T1 * W * Cin), jnp.bfloat16),
                pltpu.VMEM((M, Th * W * Chid), jnp.bfloat16),
            ],
        ),
        compiler_params=pltpu.CompilerParams(
            dimension_semantics=("parallel",)),
        cost_estimate=pl.CostEstimate(flops=flops, transcendentals=0,
                                      bytes_accessed=bytes_accessed),
    )(x_rows, w1, b1, wh, bh, wo, bo)


# ----------------------- host-side weight relayouts --------------------------

def make_pixelcnn_mask(K, mask_type):
    m = np.ones((K, K), np.float32)
    m[K // 2 + 1:, :] = 0.0
    m[:, K // 2 + 1:] = 0.0
    if mask_type == 'A':
        m[K // 2, K // 2] = 0.0
    return m


def _stacked_band_weights(w_oikk, W_out):
    """(Co, Ci, K, K) pre-masked weights -> (T*W*Ci, W*Co) stacked band matrix.

    Only surviving kh taps (kh <= K//2; the rest are zeroed by the causal mask)
    are emitted, stacked along the contraction dim.  The kw band is clipped at
    the image edges, so activations need row padding only:
        out[kh*W*Ci + wi*Ci + ci, wo*Co + co] = w[co, ci, kh, kw],  wi = wo+kw-K//2
    """
    Co, Ci, K, _ = np.shape(w_oikk)
    pad = K // 2
    T = pad + 1
    w = np.asarray(w_oikk, np.float32)
    out = np.zeros((T, W_out * Ci, W_out * Co), np.float32)
    for kh in range(T):
        for kw in range(K):
            blk = w[:, :, kh, kw].T                       # (Ci, Co)
            for wo in range(W_out):
                wi = wo + kw - pad
                if 0 <= wi < W_out:
                    out[kh, wi * Ci:(wi + 1) * Ci, wo * Co:(wo + 1) * Co] = blk
    return out.reshape(T * W_out * Ci, W_out * Co)


def _blockdiag_1x1_weights(w_oikk, W_out, co_pad):
    """(Co, Ci, 1, 1) -> (W*Ci, W*co_pad) block-diagonal 1x1-head matrix."""
    Co, Ci, _, _ = np.shape(w_oikk)
    w = np.asarray(w_oikk, np.float32)[:, :, 0, 0].T      # (Ci, Co)
    out = np.zeros((W_out * Ci, W_out * co_pad), np.float32)
    for wo in range(W_out):
        out[wo * Ci:(wo + 1) * Ci, wo * co_pad:wo * co_pad + Co] = w
    return out


def _bias_row(b, W_out, co_pad=None):
    b = np.asarray(b, np.float32)
    if co_pad is not None and co_pad > b.shape[0]:
        b = np.concatenate([b, np.zeros(co_pad - b.shape[0], np.float32)])
    return jnp.asarray(np.tile(b, W_out)[None, :])        # (1, W_out*Co)


# ----------------------------- model wrapper ---------------------------------

class PixelCNNPallas:
    def __init__(self, key, in_channels=3, colors=8, hidden_dim=32, n_layers=2,
                 height=8, width=8):
        self.in_channels = in_channels
        self.colors = colors
        self.hidden_dim = hidden_dim
        self.n_layers = n_layers
        self.height = height
        self.width = width
        self.cout = colors * in_channels
        # pad head channels so the output's last dim is a multiple of 128 lanes
        self.cout_pad = self.cout
        while (width * self.cout_pad) % 128 != 0:
            self.cout_pad += 1

        ks = jax.random.split(key, 2 * (n_layers + 2))
        scale = 0.05

        # Conv_in: Masked 'A', in_channels -> hidden_dim, 7x7, pad 3
        self.w_in = jax.random.normal(ks[0], (hidden_dim, in_channels, 7, 7),
                                      jnp.float32) * scale
        self.b_in = jax.random.normal(ks[1], (hidden_dim,), jnp.float32) * scale

        # Conv_layers: Masked 'B', hidden_dim -> hidden_dim, 3x3, pad 1
        self.w_layers, self.b_layers = [], []
        for i in range(n_layers):
            self.w_layers.append(
                jax.random.normal(ks[2 + 2 * i],
                                  (hidden_dim, hidden_dim, 3, 3),
                                  jnp.float32) * scale)
            self.b_layers.append(
                jax.random.normal(ks[3 + 2 * i], (hidden_dim,),
                                  jnp.float32) * scale)

        # Conv_out: plain 1x1, hidden_dim -> colors * in_channels
        self.w_out = jax.random.normal(
            ks[-2], (self.cout, hidden_dim, 1, 1), jnp.float32) * scale
        self.b_out = jax.random.normal(
            ks[-1], (self.cout,), jnp.float32) * scale

        # Pre-apply masks and round weights to bf16 once; kernel and reference
        # share these exact values so the tolerance check stays tight.
        mask_a = jnp.asarray(make_pixelcnn_mask(7, 'A'))[None, None, :, :]
        mask_b = jnp.asarray(make_pixelcnn_mask(3, 'B'))[None, None, :, :]
        self.w_in_ref = (self.w_in * mask_a).astype(jnp.bfloat16).astype(jnp.float32)
        self.w_layers_ref = [(w * mask_b).astype(jnp.bfloat16).astype(jnp.float32)
                             for w in self.w_layers]
        self.w_out_ref = self.w_out.astype(jnp.bfloat16).astype(jnp.float32)

        # Kernel-layout weights & biases (hoisted out of __call__), bf16 weights.
        W = width
        self.w1_k = jnp.asarray(
            _stacked_band_weights(np.asarray(self.w_in_ref), W), jnp.bfloat16)
        self.b1_k = _bias_row(self.b_in, W)                          # (1, W*Chid) f32
        self.wh_k = jnp.asarray(
            np.stack([_stacked_band_weights(np.asarray(w), W)
                      for w in self.w_layers_ref]), jnp.bfloat16)    # (L, 2*W*Chid, W*Chid)
        self.bh_k = jnp.stack([_bias_row(b, W) for b in self.b_layers])
        self.wo_k = jnp.asarray(
            _blockdiag_1x1_weights(np.asarray(self.w_out_ref), W, self.cout_pad),
            jnp.bfloat16)                                            # (W*Chid, W*Cout_pad)
        self.bo_k = _bias_row(self.b_out, W, co_pad=self.cout_pad)   # (1, W*Cout_pad) f32

    def __call__(self, x_nchw):
        N, C, H, W = x_nchw.shape
        assert C == self.in_channels and H == self.height and W == self.width
        # NCHW -> lane-dense row layout with the batch folded into M: (N*H, W*Cin)
        x_rows = jnp.transpose(x_nchw, (0, 2, 3, 1)).reshape(N * H, W * C)
        x_rows = x_rows.astype(jnp.bfloat16)

        y = _fused_forward(x_rows, self.w1_k, self.b1_k, self.wh_k, self.bh_k,
                           self.wo_k, self.bo_k,
                           N=N, H=H, W=W, Cin=C, Chid=self.hidden_dim,
                           Cout_pad=self.cout_pad, K_in=7, K_hid=3,
                           n_layers=self.n_layers)

        # (N*H, W*Cout_pad) -> NCHW, drop channel padding, split like .view
        y = y.reshape(N, H, W, self.cout_pad)[..., : self.cout]
        y = jnp.transpose(y, (0, 3, 1, 2))            # (N, colors*in_ch, H, W)
        return y.reshape(N, self.in_channels, self.colors, H, W)

    # TODO(synk): generate_image (autoregressive multinomial sampling loop) is
    # host-side control flow around forward(); not implemented as a kernel.


# ----------------------------- reference (pure JAX) ---------------------------

def _ref_conv_relu(x_nhwc, w_oikk, bias, pad):
    w_hwio = jnp.transpose(w_oikk, (2, 3, 1, 0))
    y = lax.conv_general_dilated(
        x_nhwc, w_hwio, window_strides=(1, 1),
        padding=[(pad, pad), (pad, pad)],
        dimension_numbers=('NHWC', 'HWIO', 'NHWC'),
        precision=lax.Precision.HIGHEST)
    return jnp.maximum(y + bias, 0.0)


def reference_forward(model, x_nchw):
    # bf16-matched rounding points (same as the kernel: input and the activation
    # feeding every matmul are bf16; accumulation, bias, relu in f32).
    bf = lambda a: a.astype(jnp.bfloat16).astype(jnp.float32)
    x = bf(jnp.transpose(x_nchw, (0, 2, 3, 1)).astype(jnp.float32))
    x = _ref_conv_relu(x, model.w_in_ref, model.b_in, 3)
    for w, b in zip(model.w_layers_ref, model.b_layers):
        x = _ref_conv_relu(bf(x), w, b, 1)
    x = _ref_conv_relu(bf(x), model.w_out_ref, model.b_out, 0)
    x = jnp.transpose(x, (0, 3, 1, 2))
    N, _, H, W = x.shape
    return x.reshape(N, model.in_channels, model.colors, H, W)


# ----------------------------- main -------------------------------------------

if __name__ == "__main__":
    key = jax.random.PRNGKey(0)
    k_params, k_x = jax.random.split(key)

    N, C_IN, H, W = 2, 3, 8, 8
    COLORS, HIDDEN, N_LAYERS = 8, 32, 2

    model = PixelCNNPallas(k_params, in_channels=C_IN, colors=COLORS,
                           hidden_dim=HIDDEN, n_layers=N_LAYERS,
                           height=H, width=W)

    x = jax.random.normal(k_x, (N, C_IN, H, W), jnp.float32)

    out = jax.block_until_ready(model(x))
    assert out.shape == (N, C_IN, COLORS, H, W), out.shape

    ref = jax.block_until_ready(reference_forward(model, x))
    np.testing.assert_allclose(np.asarray(out), np.asarray(ref),
                               rtol=5e-3, atol=1e-4)

    print("KERNEL_OK")
</pallas_src>

<mosaic_0001>
module attributes {stable_mosaic.version = 11 : i64} {
  func.func @_pixelcnn_kernel(%arg0: i32, %arg1: memref<16x24xbf16, #tpu.memory_space<vmem>>, %arg2: memref<96x256xbf16, #tpu.memory_space<vmem>>, %arg3: memref<1x256xf32, #tpu.memory_space<vmem>>, %arg4: memref<2x512x256xbf16, #tpu.memory_space<vmem>>, %arg5: memref<2x1x256xf32, #tpu.memory_space<vmem>>, %arg6: memref<256x256xbf16, #tpu.memory_space<vmem>>, %arg7: memref<1x256xf32, #tpu.memory_space<vmem>>, %arg8: memref<16x256xf32, #tpu.memory_space<vmem>>, %arg9: memref<16x96xbf16, #tpu.memory_space<vmem>>, %arg10: memref<16x512xbf16, #tpu.memory_space<vmem>>) attributes {dimension_semantics = [#tpu.dimension_semantics<parallel>], iteration_bounds = array<i64: 1>, scalar_prefetch = 0 : i64, scratch_operands = 2 : i64, tpu.core_type = #tpu.core_type<tc>, window_params = [{transform_indices = @transform_0, window_bounds = array<i64: 16, 24>}, {pipeline_mode = #tpu.pipeline_mode<synchronous>, transform_indices = @transform_1, window_bounds = array<i64: 96, 256>}, {pipeline_mode = #tpu.pipeline_mode<synchronous>, transform_indices = @transform_2, window_bounds = array<i64: 1, 256>}, {pipeline_mode = #tpu.pipeline_mode<synchronous>, transform_indices = @transform_3, window_bounds = array<i64: 2, 512, 256>}, {pipeline_mode = #tpu.pipeline_mode<synchronous>, transform_indices = @transform_4, window_bounds = array<i64: 2, 1, 256>}, {pipeline_mode = #tpu.pipeline_mode<synchronous>, transform_indices = @transform_5, window_bounds = array<i64: 256, 256>}, {pipeline_mode = #tpu.pipeline_mode<synchronous>, transform_indices = @transform_6, window_bounds = array<i64: 1, 256>}, {transform_indices = @transform_7, window_bounds = array<i64: 16, 256>}]} {
    %cst = arith.constant 0.000000e+00 : bf16
    %0 = vector.broadcast %cst : bf16 to vector<16x96xbf16>
    %c0 = arith.constant 0 : index
    %c0_0 = arith.constant 0 : index
    %1 = vector.load %arg9[%c0, %c0_0] : memref<16x96xbf16, #tpu.memory_space<vmem>>, vector<16x96xbf16>
    tpu.vector_store %arg9[%c0, %c0_0], %0 {strides = array<i32>} : memref<16x96xbf16, #tpu.memory_space<vmem>>, vector<16x96xbf16>,
    %c0_1 = arith.constant 0 : index
    %c0_2 = arith.constant 0 : index
    %2 = vector.load %arg1[%c0_1, %c0_2] : memref<16x24xbf16, #tpu.memory_space<vmem>>, vector<5x24xbf16>
    %c3 = arith.constant 3 : index
    %c0_3 = arith.constant 0 : index
    %3 = vector.load %arg9[%c3, %c0_3] : memref<16x96xbf16, #tpu.memory_space<vmem>>, vector<5x24xbf16>
    tpu.vector_store %arg9[%c3, %c0_3], %2 {strides = array<i32>} : memref<16x96xbf16, #tpu.memory_space<vmem>>, vector<5x24xbf16>,
    %c0_4 = arith.constant 0 : index
    %c0_5 = arith.constant 0 : index
    %4 = vector.load %arg1[%c0_4, %c0_5] : memref<16x24xbf16, #tpu.memory_space<vmem>>, vector<6x24xbf16>
    %c2 = arith.constant 2 : index
    %c24 = arith.constant 24 : index
    %5 = vector.load %arg9[%c2, %c24] : memref<16x96xbf16, #tpu.memory_space<vmem>>, vector<6x24xbf16>
    tpu.vector_store %arg9[%c2, %c24], %4 {strides = array<i32>} : memref<16x96xbf16, #tpu.memory_space<vmem>>, vector<6x24xbf16>,
    %c0_6 = arith.constant 0 : index
    %c0_7 = arith.constant 0 : index
    %6 = vector.load %arg1[%c0_6, %c0_7] : memref<16x24xbf16, #tpu.memory_space<vmem>>, vector<7x24xbf16>
    %c1 = arith.constant 1 : index
    %c48 = arith.constant 48 : index
    %7 = vector.load %arg9[%c1, %c48] : memref<16x96xbf16, #tpu.memory_space<vmem>>, vector<7x24xbf16>
    tpu.vector_store %arg9[%c1, %c48], %6 {strides = array<i32>} : memref<16x96xbf16, #tpu.memory_space<vmem>>, vector<7x24xbf16>,
    %c0_8 = arith.constant 0 : index
    %c0_9 = arith.constant 0 : index
    %8 = vector.load %arg1[%c0_8, %c0_9] : memref<16x24xbf16, #tpu.memory_space<vmem>>, vector<8x24xbf16>
    %c0_10 = arith.constant 0 : index
    %c72 = arith.constant 72 : index
    %9 = vector.load %arg9[%c0_10, %c72] : memref<16x96xbf16, #tpu.memory_space<vmem>>, vector<8x24xbf16>
    tpu.vector_store %arg9[%c0_10, %c72], %8 {strides = array<i32>} : memref<16x96xbf16, #tpu.memory_space<vmem>>, vector<8x24xbf16>,
    %c8 = arith.constant 8 : index
    %c0_11 = arith.constant 0 : index
    %10 = vector.load %arg1[%c8, %c0_11] : memref<16x24xbf16, #tpu.memory_space<vmem>>, vector<5x24xbf16>
    %c11 = arith.constant 11 : index
    %c0_12 = arith.constant 0 : index
    %11 = vector.load %arg9[%c11, %c0_12] : memref<16x96xbf16, #tpu.memory_space<vmem>>, vector<5x24xbf16>
    tpu.vector_store %arg9[%c11, %c0_12], %10 {strides = array<i32>} : memref<16x96xbf16, #tpu.memory_space<vmem>>, vector<5x24xbf16>,
    %c8_13 = arith.constant 8 : index
    %c0_14 = arith.constant 0 : index
    %12 = vector.load %arg1[%c8_13, %c0_14] : memref<16x24xbf16, #tpu.memory_space<vmem>>, vector<6x24xbf16>
    %c10 = arith.constant 10 : index
    %c24_15 = arith.constant 24 : index
    %13 = vector.load %arg9[%c10, %c24_15] : memref<16x96xbf16, #tpu.memory_space<vmem>>, vector<6x24xbf16>
    tpu.vector_store %arg9[%c10, %c24_15], %12 {strides = array<i32>} : memref<16x96xbf16, #tpu.memory_space<vmem>>, vector<6x24xbf16>,
    %c8_16 = arith.constant 8 : index
    %c0_17 = arith.constant 0 : index
    %14 = vector.load %arg1[%c8_16, %c0_17] : memref<16x24xbf16, #tpu.memory_space<vmem>>, vector<7x24xbf16>
    %c9 = arith.constant 9 : index
    %c48_18 = arith.constant 48 : index
    %15 = vector.load %arg9[%c9, %c48_18] : memref<16x96xbf16, #tpu.memory_space<vmem>>, vector<7x24xbf16>
    tpu.vector_store %arg9[%c9, %c48_18], %14 {strides = array<i32>} : memref<16x96xbf16, #tpu.memory_space<vmem>>, vector<7x24xbf16>,
    %c8_19 = arith.constant 8 : index
    %c0_20 = arith.constant 0 : index
    %16 = vector.load %arg1[%c8_19, %c0_20] : memref<16x24xbf16, #tpu.memory_space<vmem>>, vector<8x24xbf16>
    %c8_21 = arith.constant 8 : index
    %c72_22 = arith.constant 72 : index
    %17 = vector.load %arg9[%c8_21, %c72_22] : memref<16x96xbf16, #tpu.memory_space<vmem>>, vector<8x24xbf16>
    tpu.vector_store %arg9[%c8_21, %c72_22], %16 {strides = array<i32>} : memref<16x96xbf16, #tpu.memory_space<vmem>>, vector<8x24xbf16>,
    %c0_23 = arith.constant 0 : index
    %c0_24 = arith.constant 0 : index
    %18 = vector.load %arg9[%c0_23, %c0_24] : memref<16x96xbf16, #tpu.memory_space<vmem>>, vector<16x96xbf16>
    %c0_25 = arith.constant 0 : index
    %c0_26 = arith.constant 0 : index
    %19 = vector.load %arg2[%c0_25, %c0_26] : memref<96x256xbf16, #tpu.memory_space<vmem>>, vector<96x256xbf16>
    %cst_27 = arith.constant dense<0.000000e+00> : vector<16x256xf32>
    %20 = tpu.matmul %18, %19, %cst_27 {dimension_numbers = #tpu.dot_dimension_numbers<[1], [0], [0], [1], [0, 0, 1, 1], [], []>} : vector<16x96xbf16>, vector<96x256xbf16>, vector<16x256xf32> -> vector<16x256xf32>
    %c0_28 = arith.constant 0 : index
    %c0_29 = arith.constant 0 : index
    %21 = vector.load %arg3[%c0_28, %c0_29] : memref<1x256xf32, #tpu.memory_space<vmem>>, vector<1x256xf32>
    %22 = vector.broadcast %21 : vector<1x256xf32> to vector<16x256xf32>
    %23 = arith.addf %20, %22 : vector<16x256xf32>
    %cst_30 = arith.constant 0.000000e+00 : f32
    %24 = vector.broadcast %cst_30 : f32 to vector<16x256xf32>
    %25 = arith.maximumf %23, %24 : vector<16x256xf32>
    %cst_31 = arith.constant 0.000000e+00 : bf16
    %26 = vector.broadcast %cst_31 : bf16 to vector<16x512xbf16>
    %c0_32 = arith.constant 0 : index
    %c0_33 = arith.constant 0 : index
    %27 = vector.load %arg10[%c0_32, %c0_33] : memref<16x512xbf16, #tpu.memory_space<vmem>>, vector<16x512xbf16>
    tpu.vector_store %arg10[%c0_32, %c0_33], %26 {strides = array<i32>} : memref<16x512xbf16, #tpu.memory_space<vmem>>, vector<16x512xbf16>,
    %28 = arith.truncf %25 : vector<16x256xf32> to vector<16x256xbf16>
    %29 = vector.extract_strided_slice %28 {offsets = [0, 0], sizes = [7, 256], strides = [1, 1]} : vector<16x256xbf16> to vector<7x256xbf16>
    %c1_34 = arith.constant 1 : index
    %c0_35 = arith.constant 0 : index
    %30 = vector.load %arg10[%c1_34, %c0_35] : memref<16x512xbf16, #tpu.memory_space<vmem>>, vector<7x256xbf16>
    tpu.vector_store %arg10[%c1_34, %c0_35], %29 {strides = array<i32>} : memref<16x512xbf16, #tpu.memory_space<vmem>>, vector<7x256xbf16>,
    %31 = vector.extract_strided_slice %28 {offsets = [0, 0], sizes = [8, 256], strides = [1, 1]} : vector<16x256xbf16> to vector<8x256xbf16>
    %c0_36 = arith.constant 0 : index
    %c256 = arith.constant 256 : index
    %32 = vector.load %arg10[%c0_36, %c256] : memref<16x512xbf16, #tpu.memory_space<vmem>>, vector<8x256xbf16>
    tpu.vector_store %arg10[%c0_36, %c256], %31 {strides = array<i32>} : memref<16x512xbf16, #tpu.memory_space<vmem>>, vector<8x256xbf16>,
    %33 = vector.extract_strided_slice %28 {offsets = [8, 0], sizes = [7, 256], strides = [1, 1]} : vector<16x256xbf16> to vector<7x256xbf16>
    %c9_37 = arith.constant 9 : index
    %c0_38 = arith.constant 0 : index
    %34 = vector.load %arg10[%c9_37, %c0_38] : memref<16x512xbf16, #tpu.memory_space<vmem>>, vector<7x256xbf16>
    tpu.vector_store %arg10[%c9_37, %c0_38], %33 {strides = array<i32>} : memref<16x512xbf16, #tpu.memory_space<vmem>>, vector<7x256xbf16>,
    %35 = vector.extract_strided_slice %28 {offsets = [8, 0], sizes = [8, 256], strides = [1, 1]} : vector<16x256xbf16> to vector<8x256xbf16>
    %c8_39 = arith.constant 8 : index
    %c256_40 = arith.constant 256 : index
    %36 = vector.load %arg10[%c8_39, %c256_40] : memref<16x512xbf16, #tpu.memory_space<vmem>>, vector<8x256xbf16>
    tpu.vector_store %arg10[%c8_39, %c256_40], %35 {strides = array<i32>} : memref<16x512xbf16, #tpu.memory_space<vmem>>, vector<8x256xbf16>,
    %c0_41 = arith.constant 0 : index
    %c0_42 = arith.constant 0 : index
    %37 = vector.load %arg10[%c0_41, %c0_42] : memref<16x512xbf16, #tpu.memory_space<vmem>>, vector<16x512xbf16>
    %c0_43 = arith.constant 0 : index
    %c0_44 = arith.constant 0 : index
    %c0_45 = arith.constant 0 : index
    %38 = vector.load %arg4[%c0_43, %c0_44, %c0_45] : memref<2x512x256xbf16, #tpu.memory_space<vmem>>, vector<1x512x256xbf16>
    %39 = vector.shape_cast %38 : vector<1x512x256xbf16> to vector<512x256xbf16>
    %cst_46 = arith.constant dense<0.000000e+00> : vector<16x256xf32>
    %40 = tpu.matmul %37, %39, %cst_46 {dimension_numbers = #tpu.dot_dimension_numbers<[1], [0], [0], [1], [0, 0, 1, 1], [], []>} : vector<16x512xbf16>, vector<512x256xbf16>, vector<16x256xf32> -> vector<16x256xf32>
    %c0_47 = arith.constant 0 : index
    %c0_48 = arith.constant 0 : index
    %c0_49 = arith.constant 0 : index
    %41 = vector.load %arg5[%c0_47, %c0_48, %c0_49] : memref<2x1x256xf32, #tpu.memory_space<vmem>>, vector<1x1x256xf32>
    %42 = vector.shape_cast %41 : vector<1x1x256xf32> to vector<1x256xf32>
    %43 = vector.broadcast %42 : vector<1x256xf32> to vector<16x256xf32>
    %44 = arith.addf %40, %43 : vector<16x256xf32>
    %cst_50 = arith.constant 0.000000e+00 : f32
    %45 = vector.broadcast %cst_50 : f32 to vector<16x256xf32>
    %46 = arith.maximumf %44, %45 : vector<16x256xf32>
    %47 = arith.truncf %46 : vector<16x256xf32> to vector<16x256xbf16>
    %48 = vector.extract_strided_slice %47 {offsets = [0, 0], sizes = [7, 256], strides = [1, 1]} : vector<16x256xbf16> to vector<7x256xbf16>
    %c1_51 = arith.constant 1 : index
    %c0_52 = arith.constant 0 : index
    %49 = vector.load %arg10[%c1_51, %c0_52] : memref<16x512xbf16, #tpu.memory_space<vmem>>, vector<7x256xbf16>
    tpu.vector_store %arg10[%c1_51, %c0_52], %48 {strides = array<i32>} : memref<16x512xbf16, #tpu.memory_space<vmem>>, vector<7x256xbf16>,
    %50 = vector.extract_strided_slice %47 {offsets = [0, 0], sizes = [8, 256], strides = [1, 1]} : vector<16x256xbf16> to vector<8x256xbf16>
    %c0_53 = arith.constant 0 : index
    %c256_54 = arith.constant 256 : index
    %51 = vector.load %arg10[%c0_53, %c256_54] : memref<16x512xbf16, #tpu.memory_space<vmem>>, vector<8x256xbf16>
    tpu.vector_store %arg10[%c0_53, %c256_54], %50 {strides = array<i32>} : memref<16x512xbf16, #tpu.memory_space<vmem>>, vector<8x256xbf16>,
    %52 = vector.extract_strided_slice %47 {offsets = [8, 0], sizes = [7, 256], strides = [1, 1]} : vector<16x256xbf16> to vector<7x256xbf16>
    %c9_55 = arith.constant 9 : index
    %c0_56 = arith.constant 0 : index
    %53 = vector.load %arg10[%c9_55, %c0_56] : memref<16x512xbf16, #tpu.memory_space<vmem>>, vector<7x256xbf16>
    tpu.vector_store %arg10[%c9_55, %c0_56], %52 {strides = array<i32>} : memref<16x512xbf16, #tpu.memory_space<vmem>>, vector<7x256xbf16>,
    %54 = vector.extract_strided_slice %47 {offsets = [8, 0], sizes = [8, 256], strides = [1, 1]} : vector<16x256xbf16> to vector<8x256xbf16>
    %c8_57 = arith.constant 8 : index
    %c256_58 = arith.constant 256 : index
    %55 = vector.load %arg10[%c8_57, %c256_58] : memref<16x512xbf16, #tpu.memory_space<vmem>>, vector<8x256xbf16>
    tpu.vector_store %arg10[%c8_57, %c256_58], %54 {strides = array<i32>} : memref<16x512xbf16, #tpu.memory_space<vmem>>, vector<8x256xbf16>,
    %c0_59 = arith.constant 0 : index
    %c0_60 = arith.constant 0 : index
    %56 = vector.load %arg10[%c0_59, %c0_60] : memref<16x512xbf16, #tpu.memory_space<vmem>>, vector<16x512xbf16>
    %c1_61 = arith.constant 1 : index
    %c0_62 = arith.constant 0 : index
    %c0_63 = arith.constant 0 : index
    %57 = vector.load %arg4[%c1_61, %c0_62, %c0_63] : memref<2x512x256xbf16, #tpu.memory_space<vmem>>, vector<1x512x256xbf16>
    %58 = vector.shape_cast %57 : vector<1x512x256xbf16> to vector<512x256xbf16>
    %cst_64 = arith.constant dense<0.000000e+00> : vector<16x256xf32>
    %59 = tpu.matmul %56, %58, %cst_64 {dimension_numbers = #tpu.dot_dimension_numbers<[1], [0], [0], [1], [0, 0, 1, 1], [], []>} : vector<16x512xbf16>, vector<512x256xbf16>, vector<16x256xf32> -> vector<16x256xf32>
    %c1_65 = arith.constant 1 : index
    %c0_66 = arith.constant 0 : index
    %c0_67 = arith.constant 0 : index
    %60 = vector.load %arg5[%c1_65, %c0_66, %c0_67] : memref<2x1x256xf32, #tpu.memory_space<vmem>>, vector<1x1x256xf32>
    %61 = vector.shape_cast %60 : vector<1x1x256xf32> to vector<1x256xf32>
    %62 = vector.broadcast %61 : vector<1x256xf32> to vector<16x256xf32>
    %63 = arith.addf %59, %62 : vector<16x256xf32>
    %cst_68 = arith.constant 0.000000e+00 : f32
    %64 = vector.broadcast %cst_68 : f32 to vector<16x256xf32>
    %65 = arith.maximumf %63, %64 : vector<16x256xf32>
    %66 = arith.truncf %65 : vector<16x256xf32> to vector<16x256xbf16>
    %c0_69 = arith.constant 0 : index
    %c0_70 = arith.constant 0 : index
    %67 = vector.load %arg6[%c0_69, %c0_70] : memref<256x256xbf16, #tpu.memory_space<vmem>>, vector<256x256xbf16>
    %cst_71 = arith.constant dense<0.000000e+00> : vector<16x256xf32>
    %68 = tpu.matmul %66, %67, %cst_71 {dimension_numbers = #tpu.dot_dimension_numbers<[1], [0], [0], [1], [0, 0, 1, 1], [], []>} : vector<16x256xbf16>, vector<256x256xbf16>, vector<16x256xf32> -> vector<16x256xf32>
    %c0_72 = arith.constant 0 : index
    %c0_73 = arith.constant 0 : index
    %69 = vector.load %arg7[%c0_72, %c0_73] : memref<1x256xf32, #tpu.memory_space<vmem>>, vector<1x256xf32>
    %70 = vector.broadcast %69 : vector<1x256xf32> to vector<16x256xf32>
    %71 = arith.addf %68, %70 : vector<16x256xf32>
    %cst_74 = arith.constant 0.000000e+00 : f32
    %72 = vector.broadcast %cst_74 : f32 to vector<16x256xf32>
    %73 = arith.maximumf %71, %72 : vector<16x256xf32>
    %c0_75 = arith.constant 0 : index
    %c0_76 = arith.constant 0 : index
    %74 = vector.load %arg8[%c0_75, %c0_76] : memref<16x256xf32, #tpu.memory_space<vmem>>, vector<16x256xf32>
    tpu.vector_store %arg8[%c0_75, %c0_76], %73 {strides = array<i32>} : memref<16x256xf32, #tpu.memory_space<vmem>>, vector<16x256xf32>,
    return
  }
  func.func @transform_0(%arg0: i32) -> (i32, i32) {
    %c0_i32 = arith.constant 0 : i32
    %c0_i32_0 = arith.constant 0 : i32
    return %arg0, %c0_i32 : i32, i32
  }
  func.func @transform_1(%arg0: i32) -> (i32, i32) {
    %c0_i32 = arith.constant 0 : i32
    %c0_i32_0 = arith.constant 0 : i32
    %c0_i32_1 = arith.constant 0 : i32
    return %c0_i32, %c0_i32_0 : i32, i32
  }
  func.func @transform_2(%arg0: i32) -> (i32, i32) {
    %c0_i32 = arith.constant 0 : i32
    %c0_i32_0 = arith.constant 0 : i32
    %c0_i32_1 = arith.constant 0 : i32
    return %c0_i32, %c0_i32_0 : i32, i32
  }
  func.func @transform_3(%arg0: i32) -> (i32, i32, i32) {
    %c0_i32 = arith.constant 0 : i32
    %c0_i32_0 = arith.constant 0 : i32
    %c0_i32_1 = arith.constant 0 : i32
    %c0_i32_2 = arith.constant 0 : i32
    return %c0_i32, %c0_i32_0, %c0_i32_1 : i32, i32, i32
  }
  func.func @transform_4(%arg0: i32) -> (i32, i32, i32) {
    %c0_i32 = arith.constant 0 : i32
    %c0_i32_0 = arith.constant 0 : i32
    %c0_i32_1 = arith.constant 0 : i32
    %c0_i32_2 = arith.constant 0 : i32
    return %c0_i32, %c0_i32_0, %c0_i32_1 : i32, i32, i32
  }
  func.func @transform_5(%arg0: i32) -> (i32, i32) {
    %c0_i32 = arith.constant 0 : i32
    %c0_i32_0 = arith.constant 0 : i32
    %c0_i32_1 = arith.constant 0 : i32
    return %c0_i32, %c0_i32_0 : i32, i32
  }
  func.func @transform_6(%arg0: i32) -> (i32, i32) {
    %c0_i32 = arith.constant 0 : i32
    %c0_i32_0 = arith.constant 0 : i32
    %c0_i32_1 = arith.constant 0 : i32
    return %c0_i32, %c0_i32_0 : i32, i32
  }
  func.func @transform_7(%arg0: i32) -> (i32, i32) {
    %c0_i32 = arith.constant 0 : i32
    %c0_i32_0 = arith.constant 0 : i32
    return %arg0, %c0_i32 : i32, i32
  }
}

</mosaic_0001>

<bundles_post_ra>
// kernel: _fused_forward.1
= control target key start
LH: loop header
LB: loop body
LE: loop exit
PB: predicated region body
PF: predicated region fallthrough
CT: control target
= control target key end

     0   :  { %12 = vsyncpa [#allocation5], 0  ;;  %s3024_s0 = inlined_call_operand.hbm [shape: bf16[16,24], index: 0, kind: input, shape index: {}]   ;;  %s3025_s1 = inlined_call_operand.hbm [shape: bf16[96,256], index: 1, kind: input, shape index: {}]   ;;  %s3026_s2 = inlined_call_operand.hbm [shape: f32[1,256], index: 2, kind: input, shape index: {}]   ;;  %s3027_s3 = inlined_call_operand.hbm [shape: bf16[2,512,256], index: 3, kind: input, shape index: {}]   ;;  %s3028_s4 = inlined_call_operand.hbm [shape: f32[2,1,256], index: 4, kind: input, shape index: {}]   ;;  %s3029_s5 = inlined_call_operand.hbm [shape: bf16[256,256], index: 5, kind: input, shape index: {}]   ;;  %s3030_s6 = inlined_call_operand.vmem [shape: f32[1,256], index: 6, kind: input, shape index: {}]   ;;  %s3031_s7 = inlined_call_operand.hbm [shape: f32[16,256], index: 7, kind: output, shape index: {}]  }
   0x1   :  { %13 = vsyncpa [#allocation8], 0 }
   0x2   :  { %14 = vsyncpa [#allocation11], 0 }
   0x3   :  { %15 = vsyncpa [#allocation14], 0  ;;  %s34_s26 = sshll.u32 %s3025_s1, 4  ;;  %s35_s26 = int_to_ptr.hbm [resolvable:$true] %s34_s26 }
   0x4   :  { %16 = vsyncpa [#allocation6], 0  ;;  %s2846_s27 = smov [#allocation7]   ;;  %s58_s8 = sshll.u32 %s3027_s3, 4  ;;  %s59_s8 = int_to_ptr.hbm [resolvable:$true] %s58_s8 }
   0x5   :  { %s36_s28 = sshll.u32 %s2846_s27, 4  ;;  %s2847_s9 = smov 128   ;;  %s37_s28 = int_to_ptr.vmem [resolvable:$true] %s36_s28 }
   0x6   :  { %s2848_s10 = smov 8   ;;  %s2849_s11 = smov [#allocation10]  }
   0x7   :  { %42 = dma.hbm_to_vmem [thread:$0]  %s35_s26, 1536, %s37_s28, [#allocation8], %s2847_s9, %s2847_s9, %s2848_s10  }
   0x8   :  { %s60_s12 = sshll.u32 %s2849_s11, 4  ;;  %s21_s14 = sshll.u32 %s3024_s0, 4  ;;  %s61_s12 = int_to_ptr.vmem [resolvable:$true] %s60_s12  ;;  %s22_s14 = int_to_ptr.hbm [resolvable:$true] %s21_s14 }
   0x9   :  { %66 = dma.hbm_to_vmem [thread:$0]  %s59_s8, 16384, %s61_s12, [#allocation11], %s2847_s9, %s2847_s9, %s2848_s10  }
   0xa   :  { %s2850_s3 = smov [#allocation4]   ;;  %s48_s18 = sshll.u32 %s3026_s2, 4  ;;  %s49_s18 = int_to_ptr.hbm [resolvable:$true] %s48_s18 }
   0xb   :  { %s23_s15 = sshll.u32 %s2850_s3, 4  ;;  %s2851_s19 = smov 64   ;;  %s24_s15 = int_to_ptr.vmem [resolvable:$true] %s23_s15 }
   0xc   :  { %s2852_s20 = smov 4   ;;  %s2853_s21 = smov [#allocation9]  }
   0xd   :  { %29 = dma.hbm_to_vmem [thread:$0]  %s22_s14, 128, %s24_s15, [#allocation5], %s2851_s19, %s2851_s19, %s2852_s20  }
   0xe   :  { %s50_s22 = sshll.u32 %s2853_s21, 4  ;;  %s71_s24 = sshll.u32 %s3028_s4, 4  ;;  %s51_s22 = int_to_ptr.vmem [resolvable:$true] %s50_s22  ;;  %s72_s24 = int_to_ptr.hbm [resolvable:$true] %s71_s24 }
   0xf   :  { %53 = dma.hbm_to_vmem [thread:$0]  %s49_s18, 32, %s51_s22, [#allocation8]  }
  0x10   :  { %s2854_s25 = smov [#allocation12]   ;;  %s84_s2 = sshll.u32 %s3029_s5, 4  ;;  %s85_s2 = int_to_ptr.hbm [resolvable:$true] %s84_s2 }
  0x11   :  { %s73_s26 = sshll.u32 %s2854_s25, 4  ;;  %s2855_s29 = smov 32   ;;  %s74_s26 = int_to_ptr.vmem [resolvable:$true] %s73_s26 }
  0x12   :  { %s2856_s30 = smov 2   ;;  %s2857_s8 = smov [#allocation13]  }
  0x13   :  { %79 = dma.hbm_to_vmem [thread:$0]  %s72_s24, 64, %s74_s26, [#allocation11], %s2855_s29, %s2855_s29, %s2856_s30  }
  0x14   :  { %s86_s11 = sshll.u32 %s2857_s8, 4  ;;  %s87_s11 = int_to_ptr.vmem [resolvable:$true] %s86_s11 }
  0x15   :  { %92 = dma.hbm_to_vmem [thread:$0]  %s85_s2, 4096, %s87_s11, [#allocation14], %s2847_s9, %s2847_s9, %s2848_s10  }
  0x16   :  { %2836 = dma.done.wait [#allocation5], 128  }
  0x17   :  { %2837 = vsyncadd [#allocation5], 4294967168 }
  0x18   :  { %2838 = dma.done.wait [#allocation8], 1568  }
  0x19   :  { %2839 = vsyncadd [#allocation8], 4294965728 }
  0x1a   :  { %2840 = dma.done.wait [#allocation11], 16448  }
  0x1b   :  { %2841 = vsyncadd [#allocation11], 4294950848 }
  0x1c   :  { %2842 = dma.done.wait [#allocation14], 4096  }
  0x1d   :  { %2843 = vsyncadd [#allocation14], 4294963200  ;;  %vm120_vm0 = vcmask 781312   ;;  %v2858_v0 = vmov 0   ;;  %v139_v1 = vld [vmem:[#allocation4] sm:$0x7] }
  0x1e   :  { %121 = vst.msk [vmem:[#allocation2] sm:$0xf] %vm120_vm0, %v2858_v0  ;;  %v147_v2 = vld [vmem:[#allocation4] sm:$0xf]  ;;  %v141_v3 = vrot.slane %v139_v1, 7  ;;  %s2859_s4 = smov 24  }
  0x1f   :  { %122 = vst.msk [vmem:[#allocation2 + $0x4] sm:$0xf] %vm120_vm0, %v2858_v0  ;;  %v149_v4 = vshrl.u32 %v147_v2, 16  ;;  %v152_v5 = vshll.u32 %v147_v2, 16  ;;  %v191_v6 = vld [vmem:[#allocation4 + $0x4] sm:$0xf] }
  0x20   :  { %v164_v7 = vld [vmem:[#allocation4] sm:$0xf]  ;;  %142 = vrot.lane.b32.xlu0 %v141_v3, %s2859_s4  ;;  %v193_v9 = vshrl.u32 %v191_v6, 16  ;;  %s2860_s5 = smov 72   ;;  %v184_v10 = vld [vmem:[#allocation4 + $0x4] sm:$0x7] }
  0x21   :  { %v151_v8 = vrot.slane %v149_v4, 7  ;;  %166 = vrot.lane.b32.xlu2 %v164_v7, %s2860_s5  ;;  %s2861_s9 = smov 48   ;;  %v186_v12 = vrot.slane %v184_v10, 7  ;;  %v196_v14 = vshll.u32 %v191_v6, 16  ;;  %v205_v15 = vld [vmem:[#allocation4 + $0x4] sm:$0xf] }
  0x22   :  { %v195_v13 = vrot.slane %v193_v9, 7  ;;  %v123_v17 = vld [vmem:[#allocation4] sm:$0x7]  ;;  %vm133_vm1 = vcmask 191489   ;;  %vm134_vm2 = vsmask.f32 7942 }
  0x23   :  { %v154_v11 = vor.u32 %v152_v5, %v151_v8  ;;  %v125_v18 = vshrl.u32 %v123_v17, 16  ;;  %v128_v19 = vshll.u32 %v123_v17, 16  ;;  %vm2932_vm3 = vmand %vm133_vm1, %vm134_vm2  ;;  %v171_v26 = vld [vmem:[#allocation4 + $0x4] sm:$0x7]  ;;  %v1788_v27 = vld [vmem:[#allocation7 + $0x50] sm:$0xf] }
  0x24   :  { %v198_v16 = vor.u32 %v196_v14, %v195_v13  ;;  %v2480_v28 = vld [vmem:[#allocation7 + $0x54] sm:$0xf0]  ;;  %v2479_v29 = vld [vmem:[#allocation7 + $0x54] sm:$0xf]  ;;  %v1790_v31 = vld [vmem:[#allocation7 + $0x58] sm:$0xf0] }
  0x25   :  { %155 = vrot.lane.b32.xlu1 %v154_v11, %s2861_s9  ;;  %v127_v20 = vrot.slane %v125_v18, 6  ;;  %v130_v21 = vrot.slane %v128_v19, 7  ;;  %v136_v24 = vld [vmem:[#allocation2] sm:$0xe]  ;;  %v1789_v30 = vor.u32 %v2480_v28, %v1788_v27  ;;  %v1793_v32 = vor.u32 %v2479_v29, %v1790_v31  ;;  %v1780_v38 = vld [vmem:[#allocation7 + $0x40] sm:$0xf] }
  0x26   :  { %v173_v33 = vshrl.u32 %v171_v26, 16  ;;  %v176_v34 = vshll.u32 %v171_v26, 16  ;;  %v181_v37 = vld [vmem:[#allocation2 + $0x4] sm:$0xe]  ;;  %v2478_v39 = vld [vmem:[#allocation7 + $0x44] sm:$0xf0] }
  0x27   :  { %v131_v23 = vor.u32 %v130_v21, %v127_v20  ;;  %302 = vmatpush.bf16.msra.mxu0 %v1789_v30  ;;  %316 = vmatpush.bf16.msra.mxu1 %v1793_v32  ;;  %v2477_v40 = vld [vmem:[#allocation7 + $0x44] sm:$0xf]  ;;  %v1782_v41 = vld [vmem:[#allocation7 + $0x48] sm:$0xf0]  ;;  %v1781_v43 = vor.u32 %v2478_v39, %v1780_v38  ;;  %v1772_v46 = vld [vmem:[#allocation7 + $0x30] sm:$0xf] }
  0x28   :  { %187 = vrot.lane.b32.xlu0 %v186_v12, %s2859_s4  ;;  %v175_v35 = vrot.slane %v173_v33, 6  ;;  %v178_v36 = vrot.slane %v176_v34, 7  ;;  %v1785_v44 = vor.u32 %v2477_v40, %v1782_v41  ;;  %v2476_v47 = vld [vmem:[#allocation7 + $0x34] sm:$0xf0]  ;;  %v2475_v49 = vld [vmem:[#allocation7 + $0x34] sm:$0xf] }
  0x29   :  { %207 = vrot.lane.b32.xlu2 %v205_v15, %s2860_s5  ;;  %v137_v25 = vsel %vm2932_vm3, %v131_v23, %v136_v24  ;;  %v1773_v48 = vor.u32 %v2476_v47, %v1772_v46  ;;  %v1774_v50 = vld [vmem:[#allocation7 + $0x38] sm:$0xf0]  ;;  %v1764_v52 = vld [vmem:[#allocation7 + $0x20] sm:$0xf]  ;;  %v2474_v53 = vld [vmem:[#allocation7 + $0x24] sm:$0xf0] }
  0x2a   :  { %138 = vst [vmem:[#allocation2] sm:$0xe] %v137_v25  ;;  %v179_v42 = vor.u32 %v178_v36, %v175_v35  ;;  %v1777_v51 = vor.u32 %v2475_v49, %v1774_v50  ;;  %v2473_v54 = vld [vmem:[#allocation7 + $0x24] sm:$0xf]  ;;  %v1765_v55 = vor.u32 %v2474_v53, %v1764_v52  ;;  %v1766_v56 = vld [vmem:[#allocation7 + $0x28] sm:$0xf0] }
  0x2b   :  { %303 = vmatpush.bf16.msra.mxu0 %v1781_v43  ;;  %317 = vmatpush.bf16.msra.mxu1 %v1785_v44  ;;  %v1769_v57 = vor.u32 %v2473_v54, %v1766_v56  ;;  %v1756_v58 = vld [vmem:[#allocation7 + $0x10] sm:$0xf]  ;;  %v2472_v59 = vld [vmem:[#allocation7 + $0x14] sm:$0xf0]  ;;  %v2471_v60 = vld [vmem:[#allocation7 + $0x14] sm:$0xf] }
  0x2c   :  { %v182_v45 = vsel %vm2932_vm3, %v179_v42, %v181_v37  ;;  %v1757_v61 = vor.u32 %v2472_v59, %v1756_v58  ;;  %v1758_v62 = vld [vmem:[#allocation7 + $0x18] sm:$0xf0]  ;;  %v1748_v63 = vld [vmem:[#allocation7] sm:$0xf]  ;;  %v2470_v0 = vld [vmem:[#allocation7 + $0x4] sm:$0xf0] }
  0x2d   :  { %199 = vrot.lane.b32.xlu1 %v198_v16, %s2861_s9  ;;  %183 = vst [vmem:[#allocation2 + $0x4] sm:$0xe] %v182_v45  ;;  %v1761_v1 = vor.u32 %v2471_v60, %v1758_v62  ;;  %v2469_v2 = vld [vmem:[#allocation7 + $0x4] sm:$0xf]  ;;  %v1750_v3 = vld [vmem:[#allocation7 + $0x8] sm:$0xf0]  ;;  %v1749_v4 = vor.u32 %v2470_v0, %v1748_v63 }
  0x2e   :  { %v1753_v5 = vor.u32 %v2469_v2, %v1750_v3  ;;  %vm145_vm4 = vcmask 388289   ;;  %vm158_vm5 = vcmask 585088   ;;  %v1998_v6 = vld [vmem:[#allocation10 + $0x170] sm:$0xf]  ;;  %v2532_v7 = vld [vmem:[#allocation10 + $0x174] sm:$0xf0] }
  0x2f   :  { %304 = vmatpush.bf16.msra.mxu0 %v1773_v48  ;;  %318 = vmatpush.bf16.msra.mxu1 %v1777_v51  ;;  %v2062_v8 = vld [vmem:[#allocation10 + $0x1f0] sm:$0xf]  ;;  %v1999_v9 = vor.u32 %v2532_v7, %v1998_v6  ;;  %v2548_v10 = vld [vmem:[#allocation10 + $0x1f4] sm:$0xf0]  ;;  %v1990_v11 = vld [vmem:[#allocation10 + $0x160] sm:$0xf] }
  0x30   :  { %v2530_v12 = vld [vmem:[#allocation10 + $0x164] sm:$0xf0]  ;;  %v2063_v13 = vor.u32 %v2548_v10, %v2062_v8  ;;  %v2054_v14 = vld [vmem:[#allocation10 + $0x1e0] sm:$0xf]  ;;  %v1870_v16 = vld [vmem:[#allocation10 + $0x70] sm:$0xf] }
  0x31   :  { %v2546_v15 = vld [vmem:[#allocation10 + $0x1e4] sm:$0xf0]  ;;  %v1991_v17 = vor.u32 %v2530_v12, %v1990_v11  ;;  %v2500_v18 = vld [vmem:[#allocation10 + $0x74] sm:$0xf0]  ;;  %v1934_v19 = vld [vmem:[#allocation10 + $0xf0] sm:$0xf] }
  0x32   :  { %v2516_v20 = vld [vmem:[#allocation10 + $0xf4] sm:$0xf0]  ;;  %v2055_v22 = vor.u32 %v2546_v15, %v2054_v14  ;;  %v1871_v23 = vor.u32 %v2500_v18, %v1870_v16  ;;  %v1982_v25 = vld [vmem:[#allocation10 + $0x150] sm:$0xf]  ;;  %v1862_v29 = vld [vmem:[#allocation10 + $0x60] sm:$0xf] }
  0x33   :  { %305 = vmatpush.bf16.msra.mxu0 %v1765_v55  ;;  %319 = vmatpush.bf16.msra.mxu1 %v1769_v57  ;;  %v1935_v24 = vor.u32 %v2516_v20, %v1934_v19  ;;  %v2528_v26 = vld [vmem:[#allocation10 + $0x154] sm:$0xf0]  ;;  %v2046_v27 = vld [vmem:[#allocation10 + $0x1d0] sm:$0xf]  ;;  %v2498_v30 = vld [vmem:[#allocation10 + $0x64] sm:$0xf0] }
  0x34   :  { %v2544_v28 = vld [vmem:[#allocation10 + $0x1d4] sm:$0xf0]  ;;  %782 = vmatpush.bf16.msra.mxu2 %v1871_v23  ;;  %v1926_v31 = vld [vmem:[#allocation10 + $0xe0] sm:$0xf]  ;;  %v2514_v32 = vld [vmem:[#allocation10 + $0xe4] sm:$0xf0]  ;;  %v1983_v33 = vor.u32 %v2528_v26, %v1982_v25  ;;  %v1863_v34 = vor.u32 %v2498_v30, %v1862_v29 }
  0x35   :  { %796 = vmatpush.bf16.msra.mxu3 %v1935_v24  ;;  %vm159_vm6 = vsmask.f32 7938  ;;  %v1927_v35 = vor.u32 %v2514_v32, %v1926_v31  ;;  %v1974_v36 = vld [vmem:[#allocation10 + $0x140] sm:$0xf]  ;;  %v2526_v37 = vld [vmem:[#allocation10 + $0x144] sm:$0xf0]  ;;  %v2047_v39 = vor.u32 %v2544_v28, %v2046_v27 }
  0x36   :  { %v2038_v40 = vld [vmem:[#allocation10 + $0x1c0] sm:$0xf]  ;;  %v1854_v41 = vld [vmem:[#allocation10 + $0x50] sm:$0xf]  ;;  %v2496_v42 = vld [vmem:[#allocation10 + $0x54] sm:$0xf0]  ;;  %v1975_v50 = vor.u32 %v2526_v37, %v1974_v36 }
  0x37   :  { %306 = vmatpush.bf16.msra.mxu0 %v1757_v61  ;;  %320 = vmatpush.bf16.msra.mxu1 %v1761_v1  ;;  %v2542_v43 = vld [vmem:[#allocation10 + $0x1c4] sm:$0xf0]  ;;  %v1918_v44 = vld [vmem:[#allocation10 + $0xd0] sm:$0xf]  ;;  %v2512_v45 = vld [vmem:[#allocation10 + $0xd4] sm:$0xf0]  ;;  %v1855_v48 = vor.u32 %v2496_v42, %v1854_v41 }
  0x38   :  { %vm2943_vm7 = vmand %vm158_vm5, %vm159_vm6  ;;  %783 = vmatpush.bf16.msra.mxu2 %v1863_v34  ;;  %v1919_v49 = vor.u32 %v2512_v45, %v1918_v44  ;;  %vm169_vm8 = vcmask 781888   ;;  %v2039_v53 = vor.u32 %v2542_v43, %v2038_v40  ;;  %v1966_v54 = vld [vmem:[#allocation10 + $0x130] sm:$0xf]  ;;  %v2524_v55 = vld [vmem:[#allocation10 + $0x134] sm:$0xf0]  ;;  %vm296_vm9 = vcmask 785408  }
  0x39   :  { %797 = vmatpush.bf16.msra.mxu3 %v1927_v35  ;;  %v2030_v57 = vld [vmem:[#allocation10 + $0x1b0] sm:$0xf]  ;;  %v2540_v58 = vld [vmem:[#allocation10 + $0x1b4] sm:$0xf0]  ;;  %v1967_v59 = vor.u32 %v2524_v55, %v1966_v54  ;;  %v1846_v2 = vld [vmem:[#allocation10 + $0x40] sm:$0xf] }
  0x3a   :  { %v2031_v60 = vor.u32 %v2540_v58, %v2030_v57  ;;  %v2494_v3 = vld [vmem:[#allocation10 + $0x44] sm:$0xf0]  ;;  %v1958_v7 = vld [vmem:[#allocation10 + $0x120] sm:$0xf]  ;;  %v1838_v14 = vld [vmem:[#allocation10 + $0x30] sm:$0xf] }
  0x3b   :  { %307 = vmatpush.bf16.msra.mxu0 %v1749_v4  ;;  %321 = vmatpush.bf16.msra.mxu1 %v1753_v5  ;;  %v1910_v4 = vld [vmem:[#allocation10 + $0xc0] sm:$0xf]  ;;  %v1847_v5 = vor.u32 %v2494_v3, %v1846_v2  ;;  %v2510_v6 = vld [vmem:[#allocation10 + $0xc4] sm:$0xf0]  ;;  %v2492_v15 = vld [vmem:[#allocation10 + $0x34] sm:$0xf0] }
  0x3c   :  { %784 = vmatpush.bf16.msra.mxu2 %v1855_v48  ;;  %v2522_v8 = vld [vmem:[#allocation10 + $0x124] sm:$0xf0]  ;;  %v2022_v11 = vld [vmem:[#allocation10 + $0x1a0] sm:$0xf]  ;;  %v1902_v16 = vld [vmem:[#allocation10 + $0xb0] sm:$0xf] }
  0x3d   :  { %798 = vmatpush.bf16.msra.mxu3 %v1919_v49  ;;  %v1959_v10 = vor.u32 %v2522_v8, %v1958_v7  ;;  %v2538_v12 = vld [vmem:[#allocation10 + $0x1a4] sm:$0xf0]  ;;  %v2508_v18 = vld [vmem:[#allocation10 + $0xb4] sm:$0xf0]  ;;  %v1950_v19 = vld [vmem:[#allocation10 + $0x110] sm:$0xf] }
  0x3e   :  { %v2520_v20 = vld [vmem:[#allocation10 + $0x114] sm:$0xf0]  ;;  %v2014_v23 = vld [vmem:[#allocation10 + $0x190] sm:$0xf]  ;;  %v1830_v26 = vld [vmem:[#allocation10 + $0x20] sm:$0xf] }
  0x3f   :  { %810 = vmatpush.bf16.msrb.mxu0 %v1999_v9  ;;  %824 = vmatpush.bf16.msrb.mxu1 %v2063_v13  ;;  %v1911_v9 = vor.u32 %v2510_v6, %v1910_v4  ;;  %v2023_v13 = vor.u32 %v2538_v12, %v2022_v11  ;;  %v2536_v24 = vld [vmem:[#allocation10 + $0x194] sm:$0xf0]  ;;  %v2490_v27 = vld [vmem:[#allocation10 + $0x24] sm:$0xf0]  ;;  %v1894_v28 = vld [vmem:[#allocation10 + $0xa0] sm:$0xf] }
  0x40   :  { %785 = vmatpush.bf16.msra.mxu2 %v1847_v5  ;;  %v2015_v25 = vor.u32 %v2536_v24, %v2014_v23  ;;  %v1831_v29 = vor.u32 %v2490_v27, %v1830_v26  ;;  %v2506_v30 = vld [vmem:[#allocation10 + $0xa4] sm:$0xf0]  ;;  %v1942_v31 = vld [vmem:[#allocation10 + $0x100] sm:$0xf]  ;;  %v2531_v37 = vld [vmem:[#allocation10 + $0x174] sm:$0xf] }
  0x41   :  { %799 = vmatpush.bf16.msra.mxu3 %v1911_v9  ;;  %v2518_v32 = vld [vmem:[#allocation10 + $0x104] sm:$0xf0]  ;;  %v2006_v35 = vld [vmem:[#allocation10 + $0x180] sm:$0xf]  ;;  %v2547_v40 = vld [vmem:[#allocation10 + $0x1f4] sm:$0xf] }
  0x42   :  { %v1943_v34 = vor.u32 %v2518_v32, %v1942_v31  ;;  %v2534_v36 = vld [vmem:[#allocation10 + $0x184] sm:$0xf0]  ;;  %v2064_v41 = vld [vmem:[#allocation10 + $0x1f8] sm:$0xf0]  ;;  %v1822_v44 = vld [vmem:[#allocation10 + $0x10] sm:$0xf] }
  0x43   :  { %811 = vmatpush.bf16.msrb.mxu0 %v1991_v17  ;;  %825 = vmatpush.bf16.msrb.mxu1 %v2055_v22  ;;  %v1839_v17 = vor.u32 %v2492_v15, %v1838_v14  ;;  %v1951_v22 = vor.u32 %v2520_v20, %v1950_v19  ;;  %v2067_v43 = vor.u32 %v2547_v40, %v2064_v41  ;;  %v2488_v45 = vld [vmem:[#allocation10 + $0x14] sm:$0xf0]  ;;  %v1886_v46 = vld [vmem:[#allocation10 + $0x90] sm:$0xf]  ;;  %v2056_v54 = vld [vmem:[#allocation10 + $0x1e8] sm:$0xf0] }
  0x44   :  { %v2504_v48 = vld [vmem:[#allocation10 + $0x94] sm:$0xf0]  ;;  %v2486_v57 = vld [vmem:[#allocation10 + $0x4] sm:$0xf0]  ;;  %v1878_v58 = vld [vmem:[#allocation10 + $0x80] sm:$0xf] }
  0x45   :  { %786 = vmatpush.bf16.msra.mxu2 %v1839_v17  ;;  %v1887_v49 = vor.u32 %v2504_v48, %v1886_v46  ;;  %v1936_v2 = vld [vmem:[#allocation10 + $0xf8] sm:$0xf0]  ;;  %v2527_v3 = vld [vmem:[#allocation10 + $0x154] sm:$0xf]  ;;  %v1864_v11 = vld [vmem:[#allocation10 + $0x68] sm:$0xf0] }
  0x46   :  { %v1984_v5 = vld [vmem:[#allocation10 + $0x158] sm:$0xf0]  ;;  %v2543_v6 = vld [vmem:[#allocation10 + $0x1d4] sm:$0xf]  ;;  %v2513_v12 = vld [vmem:[#allocation10 + $0xe4] sm:$0xf] }
  0x47   :  { %812 = vmatpush.bf16.msrb.mxu0 %v1983_v33  ;;  %826 = vmatpush.bf16.msrb.mxu1 %v2047_v39  ;;  %v1895_v33 = vor.u32 %v2506_v30, %v1894_v28  ;;  %v2000_v39 = vld [vmem:[#allocation10 + $0x178] sm:$0xf0]  ;;  %v1987_v8 = vor.u32 %v2527_v3, %v1984_v5  ;;  %v1928_v14 = vld [vmem:[#allocation10 + $0xe8] sm:$0xf0]  ;;  %v2525_v15 = vld [vmem:[#allocation10 + $0x144] sm:$0xf] }
  0x48   :  { %v2003_v42 = vor.u32 %v2531_v37, %v2000_v39  ;;  %v2048_v7 = vld [vmem:[#allocation10 + $0x1d8] sm:$0xf0]  ;;  %v1931_v17 = vor.u32 %v2513_v12, %v1928_v14  ;;  %v2541_v19 = vld [vmem:[#allocation10 + $0x1c4] sm:$0xf]  ;;  %v2040_v20 = vld [vmem:[#allocation10 + $0x1c8] sm:$0xf0] }
  0x49   :  { %787 = vmatpush.bf16.msra.mxu2 %v1831_v29  ;;  %v2051_v9 = vor.u32 %v2543_v6, %v2048_v7  ;;  %v1856_v23 = vld [vmem:[#allocation10 + $0x58] sm:$0xf0]  ;;  %v2511_v24 = vld [vmem:[#allocation10 + $0xd4] sm:$0xf]  ;;  %v2509_v37 = vld [vmem:[#allocation10 + $0xc4] sm:$0xf] }
  0x4a   :  { %v1920_v26 = vld [vmem:[#allocation10 + $0xd8] sm:$0xf0]  ;;  %v2523_v27 = vld [vmem:[#allocation10 + $0x134] sm:$0xf]  ;;  %v1912_v39 = vld [vmem:[#allocation10 + $0xc8] sm:$0xf0] }
  0x4b   :  { %813 = vmatpush.bf16.msrb.mxu0 %v1975_v50  ;;  %827 = vmatpush.bf16.msrb.mxu1 %v2039_v53  ;;  %v2529_v50 = vld [vmem:[#allocation10 + $0x164] sm:$0xf]  ;;  %v1968_v28 = vld [vmem:[#allocation10 + $0x138] sm:$0xf0]  ;;  %v1923_v30 = vor.u32 %v2511_v24, %v1920_v26  ;;  %v2539_v32 = vld [vmem:[#allocation10 + $0x1b4] sm:$0xf] }
  0x4c   :  { %v2954_v29 = vld [vmem:[#allocation9] sm:$0x3]  ;;  %v1971_v31 = vor.u32 %v2523_v27, %v1968_v28  ;;  %v2521_v40 = vld [vmem:[#allocation10 + $0x124] sm:$0xf]  ;;  %v1960_v41 = vld [vmem:[#allocation10 + $0x128] sm:$0xf0] }
  0x4d   :  { %vm346_vm10 = vcmask 1043456   ;;  %vm348_vm11 = vcmask 1047556   ;;  %vm349_vm12 = vsmask.f32 7954  ;;  %v228_v48 = vperm.slane %v2954_v29, 1  ;;  %s1726_s3 = sshll.u32 %s3031_s7, 4  ;;  %s1727_s3 = int_to_ptr.hbm [resolvable:$true] %s1726_s3 }
  0x4e   :  { %v2505_v3 = vld [vmem:[#allocation10 + $0xa4] sm:$0xf]  ;;  %v2487_v14 = vld [vmem:[#allocation10 + $0x14] sm:$0xf]  ;;  %vm2960_vm13 = vmand %vm346_vm10, %vm159_vm6  ;;  %s2863_s15 = smov 256   ;;  %s2864_s16 = smov 16  }
  0x4f   :  { %814 = vmatpush.bf16.msrb.mxu0 %v1967_v59  ;;  %828 = vmatpush.bf16.msrb.mxu1 %v2031_v60  ;;  %v2502_v60 = vld [vmem:[#allocation10 + $0x84] sm:$0xf0]  ;;  %v2517_v7 = vld [vmem:[#allocation10 + $0x104] sm:$0xf]  ;;  %vm350_vm14 = vmand %vm348_vm11, %vm349_vm12 }
  0x50   :  { %vm2968_vm15 = vmor %vm350_vm14, %vm2960_vm13 }
  0x53   :  { %815 = vmatpush.bf16.msrb.mxu0 %v1959_v10  ;;  %829 = vmatpush.bf16.msrb.mxu1 %v2023_v13  ;;  %v2497_v10 = vld [vmem:[#allocation10 + $0x64] sm:$0xf] }
  0x54   :  { %v1867_v13 = vor.u32 %v2497_v10, %v1864_v11 }
  0x57   :  { %816 = vmatpush.bf16.msrb.mxu0 %v1951_v22  ;;  %830 = vmatpush.bf16.msrb.mxu1 %v2015_v25  ;;  %v2495_v22 = vld [vmem:[#allocation10 + $0x54] sm:$0xf] }
  0x58   :  { %v1859_v25 = vor.u32 %v2495_v22, %v1856_v23 }
  0x5b   :  { %817 = vmatpush.bf16.msrb.mxu0 %v1943_v34 }
  0x7b   :  { %v167_v47 = vpop.permute.xlu2 %166 }
  0x83   :  { %v208_v63 = vpop.permute.xlu2 %207 }
  0x92   :  { %v143_v21 = vpop.permute.xlu0 %142 }
  0x93   :  { %146 = vst.msk [vmem:[#allocation2] sm:$0xe] %vm145_vm4, %v143_v21  ;;  %v1903_v21 = vor.u32 %v2508_v18, %v1902_v16  ;;  %v1976_v16 = vld [vmem:[#allocation10 + $0x148] sm:$0xf0] }
  0x94   :  { %v1979_v18 = vor.u32 %v2525_v15, %v1976_v16  ;;  %v1824_v16 = vld [vmem:[#allocation10 + $0x18] sm:$0xf0] }
  0x95   :  { %800 = vmatpush.bf16.msra.mxu3 %v1903_v21  ;;  %v2043_v21 = vor.u32 %v2541_v19, %v2040_v20  ;;  %v1827_v20 = vor.u32 %v2487_v14, %v1824_v16  ;;  %v2318_v16 = vld [vmem:[#allocation10 + $0x3d0] sm:$0xf] }
  0x97   :  { %v156_v38 = vpop.permute.xlu1 %155 }
  0x99   :  { %801 = vmatpush.bf16.msra.mxu3 %v1895_v33  ;;  %v2032_v33 = vld [vmem:[#allocation10 + $0x1b8] sm:$0xf0] }
  0x9a   :  { %v161_v51 = vld [vmem:[#allocation2] sm:$0xf]  ;;  %v188_v52 = vpop.permute.xlu0 %187  ;;  %v2035_v34 = vor.u32 %v2539_v32, %v2032_v33  ;;  %v2398_v32 = vld [vmem:[#allocation13 + $0x70] sm:$0xf] }
  0x9b   :  { %v162_v56 = vsel %vm2943_vm7, %v156_v38, %v161_v51  ;;  %190 = vst.msk [vmem:[#allocation2 + $0x4] sm:$0xe] %vm145_vm4, %v188_v52  ;;  %v2007_v38 = vor.u32 %v2534_v36, %v2006_v35  ;;  %v1992_v51 = vld [vmem:[#allocation10 + $0x168] sm:$0xf0]  ;;  %v2545_v52 = vld [vmem:[#allocation10 + $0x1e4] sm:$0xf] }
  0x9c   :  { %163 = vst [vmem:[#allocation2] sm:$0xf] %v162_v56  ;;  %v1995_v53 = vor.u32 %v2529_v50, %v1992_v51  ;;  %v2059_v55 = vor.u32 %v2545_v52, %v2056_v54  ;;  %v1814_v56 = vld [vmem:[#allocation10] sm:$0xf]  ;;  %v2493_v35 = vld [vmem:[#allocation10 + $0x44] sm:$0xf] }
  0x9d   :  { %170 = vst.msk [vmem:[#allocation2] sm:$0xf] %vm169_vm8, %v167_v47  ;;  %831 = vmatpush.bf16.msrb.mxu1 %v2007_v38  ;;  %v1823_v47 = vor.u32 %v2488_v45, %v1822_v44  ;;  %802 = vmatpush.bf16.msra.mxu3 %v1887_v49  ;;  %v1815_v59 = vor.u32 %v2486_v57, %v1814_v56  ;;  %v1848_v36 = vld [vmem:[#allocation10 + $0x48] sm:$0xf0]  ;;  %v2537_v44 = vld [vmem:[#allocation10 + $0x1a4] sm:$0xf] }
  0x9e   :  { %v1851_v38 = vor.u32 %v2493_v35, %v1848_v36  ;;  %v2024_v45 = vld [vmem:[#allocation10 + $0x1a8] sm:$0xf0]  ;;  %v2491_v49 = vld [vmem:[#allocation10 + $0x34] sm:$0xf]  ;;  %v1840_v50 = vld [vmem:[#allocation10 + $0x38] sm:$0xf0] }
  0x9f   :  { %v200_v61 = vpop.permute.xlu1 %199  ;;  %788 = vmatpush.bf16.msra.mxu2 %v1823_v47  ;;  %v2027_v46 = vor.u32 %v2537_v44, %v2024_v45  ;;  %v227_v47 = vperm.slane %v2954_v29, 0  ;;  %v2507_v51 = vld [vmem:[#allocation10 + $0xb4] sm:$0xf]  ;;  %v1843_v52 = vor.u32 %v2491_v49, %v1840_v50  ;;  %v1880_v35 = vld [vmem:[#allocation10 + $0x88] sm:$0xf0] }
  0xa0   :  { %v2519_v54 = vld [vmem:[#allocation10 + $0x114] sm:$0xf] }
  0xa2   :  { %v202_v62 = vld [vmem:[#allocation2 + $0x4] sm:$0xf] }
  0xa3   :  { %v203_v0 = vsel %vm2943_vm7, %v200_v61, %v202_v62  ;;  %v2499_v61 = vld [vmem:[#allocation10 + $0x74] sm:$0xf]  ;;  %v1872_v62 = vld [vmem:[#allocation10 + $0x78] sm:$0xf0]  ;;  %789 = vmatpush.bf16.msra.mxu2 %v1815_v59 }
  0xa4   :  { %204 = vst [vmem:[#allocation2 + $0x4] sm:$0xf] %v203_v0  ;;  %v1875_v0 = vor.u32 %v2499_v61, %v1872_v62  ;;  %v2016_v61 = vld [vmem:[#allocation10 + $0x198] sm:$0xf0]  ;;  %v2489_v62 = vld [vmem:[#allocation10 + $0x24] sm:$0xf] }
  0xa5   :  { %210 = vst.msk [vmem:[#allocation2 + $0x4] sm:$0xf] %vm169_vm8, %v208_v63  ;;  %v1879_v63 = vor.u32 %v2502_v60, %v1878_v58  ;;  %v2535_v60 = vld [vmem:[#allocation10 + $0x194] sm:$0xf] }
  0xa7   :  { %803 = vmatpush.bf16.msra.mxu3 %v1879_v63  ;;  %838 = vmatpush.bf16.msrb.mxu2 %v1875_v0 }
  0xab   :  { %839 = vmatpush.bf16.msrb.mxu2 %v1867_v13  ;;  %v2008_v13 = vld [vmem:[#allocation10 + $0x188] sm:$0xf0] }
  0xac   :  { %v2468_v1 = vld [vmem:[#allocation2] sm:$0xff] }
  0xad   :  { %1794 = vmatmul.msk.bf16.vlgmr.msra.gmra.mxu0 %vm296_vm9, %v2468_v1  ;;  %1795 = vmatmul.msk.bf16.vlgmr.msra.gmra.mxu1 %vm296_vm9, %v2468_v1  ;;  %v2515_v1 = vld [vmem:[#allocation10 + $0xf4] sm:$0xf] }
  0xae   :  { %866 = vmatpush.bf16.msra.mxu0 %v2003_v42  ;;  %880 = vmatpush.bf16.msra.mxu1 %v2067_v43  ;;  %v1939_v4 = vor.u32 %v2515_v1, %v1936_v2  ;;  %v1915_v42 = vor.u32 %v2509_v37, %v1912_v39  ;;  %v1963_v43 = vor.u32 %v2521_v40, %v1960_v41  ;;  %v1832_v2 = vld [vmem:[#allocation10 + $0x28] sm:$0xf0] }
  0xaf   :  { %840 = vmatpush.bf16.msrb.mxu2 %v1859_v25  ;;  %v2019_v1 = vor.u32 %v2535_v60, %v2016_v61  ;;  %v1835_v5 = vor.u32 %v2489_v62, %v1832_v2  ;;  %v2600_v60 = vld [vmem:[#allocation10 + $0x374] sm:$0xf0]  ;;  %v2334_v61 = vld [vmem:[#allocation10 + $0x3f0] sm:$0xf]  ;;  %v2598_v2 = vld [vmem:[#allocation10 + $0x364] sm:$0xf0] }
  0xb0   :  { %852 = vmatpush.bf16.msrb.mxu3 %v1939_v4  ;;  %v1896_v4 = vld [vmem:[#allocation10 + $0xa8] sm:$0xf0] }
  0xb1   :  { %v1899_v6 = vor.u32 %v2505_v3, %v1896_v4  ;;  %v2326_v3 = vld [vmem:[#allocation10 + $0x3e0] sm:$0xf] }
  0xb2   :  { %867 = vmatpush.bf16.msra.mxu0 %v1995_v53  ;;  %881 = vmatpush.bf16.msra.mxu1 %v2059_v55  ;;  %v1904_v53 = vld [vmem:[#allocation10 + $0xb8] sm:$0xf0] }
  0xb3   :  { %841 = vmatpush.bf16.msrb.mxu2 %v1851_v38  ;;  %v1952_v55 = vld [vmem:[#allocation10 + $0x118] sm:$0xf0]  ;;  %v1907_v58 = vor.u32 %v2507_v51, %v1904_v53 }
  0xb4   :  { %853 = vmatpush.bf16.msrb.mxu3 %v1931_v17  ;;  %v1955_v59 = vor.u32 %v2519_v54, %v1952_v55  ;;  %v2503_v17 = vld [vmem:[#allocation10 + $0x94] sm:$0xf] }
  0xb6   :  { %868 = vmatpush.bf16.msra.mxu0 %v1987_v8  ;;  %882 = vmatpush.bf16.msra.mxu1 %v2051_v9  ;;  %v1944_v8 = vld [vmem:[#allocation10 + $0x108] sm:$0xf0]  ;;  %v2533_v9 = vld [vmem:[#allocation10 + $0x184] sm:$0xf] }
  0xb7   :  { %842 = vmatpush.bf16.msrb.mxu2 %v1843_v52  ;;  %v1947_v12 = vor.u32 %v2517_v7, %v1944_v8  ;;  %v2011_v15 = vor.u32 %v2533_v9, %v2008_v13  ;;  %v2142_v7 = vld [vmem:[#allocation10 + $0x270] sm:$0xf]  ;;  %v2568_v8 = vld [vmem:[#allocation10 + $0x274] sm:$0xf0] }
  0xb8   :  { %854 = vmatpush.bf16.msrb.mxu3 %v1923_v30  ;;  %v2485_v30 = vld [vmem:[#allocation10 + $0x4] sm:$0xf]  ;;  %v2206_v9 = vld [vmem:[#allocation10 + $0x2f0] sm:$0xf]  ;;  %v2596_v13 = vld [vmem:[#allocation10 + $0x354] sm:$0xf0] }
  0xba   :  { %869 = vmatpush.bf16.msra.mxu0 %v1979_v18  ;;  %883 = vmatpush.bf16.msra.mxu1 %v2043_v21  ;;  %v1888_v18 = vld [vmem:[#allocation10 + $0x98] sm:$0xf0]  ;;  %v2198_v21 = vld [vmem:[#allocation10 + $0x2e0] sm:$0xf] }
  0xbb   :  { %843 = vmatpush.bf16.msrb.mxu2 %v1835_v5  ;;  %v1891_v22 = vor.u32 %v2503_v17, %v1888_v18  ;;  %v2614_v5 = vld [vmem:[#allocation10 + $0x3e4] sm:$0xf0]  ;;  %v2612_v17 = vld [vmem:[#allocation10 + $0x3d4] sm:$0xf0] }
  0xbc   :  { %855 = vmatpush.bf16.msrb.mxu3 %v1915_v42  ;;  %v2319_v18 = vor.u32 %v2612_v17, %v2318_v16 }
  0xbe   :  { %870 = vmatpush.bf16.msra.mxu0 %v1971_v31  ;;  %884 = vmatpush.bf16.msra.mxu1 %v2035_v34  ;;  %v1816_v31 = vld [vmem:[#allocation10 + $0x8] sm:$0xf0]  ;;  %v2501_v34 = vld [vmem:[#allocation10 + $0x84] sm:$0xf] }
  0xbf   :  { %844 = vmatpush.bf16.msrb.mxu2 %v1827_v20  ;;  %v1819_v33 = vor.u32 %v2485_v30, %v1816_v31  ;;  %v1883_v39 = vor.u32 %v2501_v34, %v1880_v35  ;;  %v2566_v20 = vld [vmem:[#allocation10 + $0x264] sm:$0xf0]  ;;  %v2126_v31 = vld [vmem:[#allocation10 + $0x250] sm:$0xf] }
  0xc0   :  { %856 = vmatpush.bf16.msrb.mxu3 %v1907_v58  ;;  %v2190_v35 = vld [vmem:[#allocation10 + $0x2d0] sm:$0xf] }
  0xc2   :  { %871 = vmatpush.bf16.msra.mxu0 %v1963_v43  ;;  %885 = vmatpush.bf16.msra.mxu1 %v2027_v46 }
  0xc3   :  { %845 = vmatpush.bf16.msrb.mxu2 %v1819_v33  ;;  %v2564_v33 = vld [vmem:[#allocation10 + $0x254] sm:$0xf0] }
  0xc4   :  { %857 = vmatpush.bf16.msrb.mxu3 %v1899_v6  ;;  %v2327_v6 = vor.u32 %v2614_v5, %v2326_v3  ;;  %v2127_v34 = vor.u32 %v2564_v33, %v2126_v31  ;;  %v2604_v5 = vld [vmem:[#allocation10 + $0x394] sm:$0xf0] }
  0xc6   :  { %872 = vmatpush.bf16.msra.mxu0 %v1955_v59  ;;  %886 = vmatpush.bf16.msra.mxu1 %v2019_v1  ;;  %v2270_v59 = vld [vmem:[#allocation10 + $0x370] sm:$0xf]  ;;  %v2262_v1 = vld [vmem:[#allocation10 + $0x360] sm:$0xf] }
  0xc7   :  { %v2271_v62 = vor.u32 %v2600_v60, %v2270_v59  ;;  %v2263_v4 = vor.u32 %v2598_v2, %v2262_v1  ;;  %v2110_v59 = vld [vmem:[#allocation10 + $0x230] sm:$0xf]  ;;  %v2560_v60 = vld [vmem:[#allocation10 + $0x234] sm:$0xf0] }
  0xc8   :  { %858 = vmatpush.bf16.msrb.mxu3 %v1891_v22  ;;  %v2588_v1 = vld [vmem:[#allocation10 + $0x314] sm:$0xf0] }
  0xca   :  { %873 = vmatpush.bf16.msra.mxu0 %v1947_v12  ;;  %887 = vmatpush.bf16.msra.mxu1 %v2011_v15  ;;  %v2254_v12 = vld [vmem:[#allocation10 + $0x350] sm:$0xf] }
  0xcb   :  { %v2255_v15 = vor.u32 %v2596_v13, %v2254_v12  ;;  %v2574_v12 = vld [vmem:[#allocation10 + $0x2a4] sm:$0xf0]  ;;  %v2214_v13 = vld [vmem:[#allocation10 + $0x300] sm:$0xf] }
  0xcc   :  { %859 = vmatpush.bf16.msrb.mxu3 %v1883_v39  ;;  %v2592_v39 = vld [vmem:[#allocation10 + $0x334] sm:$0xf0] }
 0x12a   :  { %v309_v56 = vpop.f32.mrf.mxu0  ;;  %v323_v57 = vpop.f32.mrf.mxu1 }
 0x12b   :  { %v310_v63 = vadd.f32 %v309_v56, %v227_v47  ;;  %v324_v0 = vadd.f32 %v323_v57, %v228_v48 }
 0x12d   :  { %v328_v10 = vmax.f32 %v310_v63, 0.0  ;;  %v329_v11 = vmax.f32 %v324_v0, 0.0  ;;  %v2616_v63 = vld [vmem:[#allocation10 + $0x3f4] sm:$0xf0] }
 0x12e   :  { %v2335_v0 = vor.u32 %v2616_v63, %v2334_v61  ;;  %v2174_v61 = vld [vmem:[#allocation10 + $0x2b0] sm:$0xf]  ;;  %v2576_v63 = vld [vmem:[#allocation10 + $0x2b4] sm:$0xf0] }
 0x12f   :  { %v336_v19 = vpack.c.bf16 %v329_v11, %v328_v10  ;;  %v2143_v10 = vor.u32 %v2568_v8, %v2142_v7  ;;  %v2584_v11 = vld [vmem:[#allocation10 + $0x2f4] sm:$0xf0]  ;;  %v2175_v2 = vor.u32 %v2576_v63, %v2174_v61  ;;  %v2102_v8 = vld [vmem:[#allocation10 + $0x220] sm:$0xf]  ;;  %v2611_v61 = vld [vmem:[#allocation10 + $0x3d4] sm:$0xf] }
 0x130   :  { %v2207_v14 = vor.u32 %v2584_v11, %v2206_v9  ;;  %v2558_v9 = vld [vmem:[#allocation10 + $0x224] sm:$0xf0] }
 0x131   :  { %v339_v23 = vshrl.u32 %v336_v19, 16  ;;  %355 = vst [vmem:[#allocation3 + $0x8] sm:$0xff] %v336_v19  ;;  %v342_v27 = vshll.u32 %v336_v19, 16  ;;  %v2134_v19 = vld [vmem:[#allocation10 + $0x260] sm:$0xf]  ;;  %v2103_v11 = vor.u32 %v2558_v9, %v2102_v8 }
 0x132   :  { %v311_v24 = vpop.f32.mrf.mxu0  ;;  %v325_v25 = vpop.f32.mrf.mxu1  ;;  %v2135_v22 = vor.u32 %v2566_v20, %v2134_v19  ;;  %v2602_v19 = vld [vmem:[#allocation10 + $0x384] sm:$0xf0]  ;;  %v2599_v20 = vld [vmem:[#allocation10 + $0x374] sm:$0xf]  ;;  %v2581_v8 = vld [vmem:[#allocation10 + $0x2e4] sm:$0xf] }
 0x133   :  { %v341_v26 = vrot.slane %v339_v23, 7  ;;  %v312_v28 = vadd.f32 %v311_v24, %v227_v47  ;;  %v326_v29 = vadd.f32 %v325_v25, %v228_v48  ;;  %v2582_v23 = vld [vmem:[#allocation10 + $0x2e4] sm:$0xf0]  ;;  %v2246_v24 = vld [vmem:[#allocation10 + $0x340] sm:$0xf] }
 0x134   :  { %v2594_v25 = vld [vmem:[#allocation10 + $0x344] sm:$0xf0] }
 0x135   :  { %v344_v36 = vor.u32 %v342_v27, %v341_v26  ;;  %v330_v37 = vmax.f32 %v312_v28, 0.0  ;;  %v331_v38 = vmax.f32 %v326_v29, 0.0  ;;  %v2199_v26 = vor.u32 %v2582_v23, %v2198_v21  ;;  %v2310_v28 = vld [vmem:[#allocation10 + $0x3c0] sm:$0xf]  ;;  %v2610_v29 = vld [vmem:[#allocation10 + $0x3c4] sm:$0xf0] }
 0x136   :  { %v2247_v27 = vor.u32 %v2594_v25, %v2246_v24  ;;  %v2311_v30 = vor.u32 %v2610_v29, %v2310_v28  ;;  %v2615_v23 = vld [vmem:[#allocation10 + $0x3f4] sm:$0xf]  ;;  %v2336_v24 = vld [vmem:[#allocation10 + $0x3f8] sm:$0xf0]  ;;  %v2094_v28 = vld [vmem:[#allocation10 + $0x210] sm:$0xf] }
 0x137   :  { %v2974_v40 = vsel %vm2968_vm15, %v344_v36, 0  ;;  %v337_v41 = vpack.c.bf16 %v331_v38, %v330_v37  ;;  %v2580_v36 = vld [vmem:[#allocation10 + $0x2d4] sm:$0xf0]  ;;  %v2238_v37 = vld [vmem:[#allocation10 + $0x330] sm:$0xf] }
 0x138   :  { %354 = vst [vmem:[#allocation3] sm:$0xff] %v2974_v40  ;;  %v1806_v47 = vld [vmem:[#allocation3 + $0x8] sm:$0xf]  ;;  %v2482_v48 = vld [vmem:[#allocation3 + $0xc] sm:$0xf]  ;;  %v2191_v38 = vor.u32 %v2580_v36, %v2190_v35 }
 0x139   :  { %v357_v42 = vshrl.u32 %v337_v41, 16  ;;  %367 = vst [vmem:[#allocation3 + $0x18] sm:$0xff] %v337_v41  ;;  %v360_v44 = vshll.u32 %v337_v41, 16  ;;  %v2302_v41 = vld [vmem:[#allocation10 + $0x3b0] sm:$0xf] }
 0x13a   :  { %v2556_v29 = vld [vmem:[#allocation10 + $0x214] sm:$0xf0] }
 0x13b   :  { %v359_v43 = vrot.slane %v357_v42, 7  ;;  %v2608_v42 = vld [vmem:[#allocation10 + $0x3b4] sm:$0xf0] }
 0x13c   :  { %v2572_v35 = vld [vmem:[#allocation10 + $0x294] sm:$0xf0] }
 0x13d   :  { %v362_v45 = vor.u32 %v360_v44, %v359_v43  ;;  %v2239_v43 = vor.u32 %v2592_v39, %v2238_v37  ;;  %v2303_v44 = vor.u32 %v2608_v42, %v2302_v41  ;;  %v2597_v37 = vld [vmem:[#allocation10 + $0x364] sm:$0xf]  ;;  %v2328_v42 = vld [vmem:[#allocation10 + $0x3e8] sm:$0xf0] }
 0x13e   :  { %v2613_v39 = vld [vmem:[#allocation10 + $0x3e4] sm:$0xf] }
 0x13f   :  { %v2979_v46 = vsel %vm2968_vm15, %v362_v45, 0  ;;  %v1798_v53 = vld [vmem:[#allocation3] sm:$0xf]  ;;  %v2481_v55 = vld [vmem:[#allocation3 + $0x4] sm:$0xf] }
 0x140   :  { %366 = vst [vmem:[#allocation3 + $0x10] sm:$0xff] %v2979_v46  ;;  %v2484_v49 = vld [vmem:[#allocation3 + $0x14] sm:$0xf0]  ;;  %v1808_v50 = vld [vmem:[#allocation3 + $0x18] sm:$0xf0] }
 0x141   :  { %v1807_v51 = vor.u32 %v2484_v49, %v1806_v47  ;;  %v1811_v52 = vor.u32 %v2482_v48, %v1808_v50  ;;  %v2118_v45 = vld [vmem:[#allocation10 + $0x240] sm:$0xf]  ;;  %v2562_v47 = vld [vmem:[#allocation10 + $0x244] sm:$0xf0] }
 0x142   :  { %v2182_v48 = vld [vmem:[#allocation10 + $0x2c0] sm:$0xf]  ;;  %v2119_v49 = vor.u32 %v2562_v47, %v2118_v45  ;;  %v2578_v50 = vld [vmem:[#allocation10 + $0x2c4] sm:$0xf0] }
 0x143   :  { %818 = vmatmul.bf16.vlgmr.msrb.gmra.mxu0 %v1807_v51  ;;  %832 = vmatmul.bf16.vlgmr.msrb.gmra.mxu1 %v1811_v52  ;;  %v2086_v45 = vld [vmem:[#allocation10 + $0x200] sm:$0xf]  ;;  %v2554_v47 = vld [vmem:[#allocation10 + $0x204] sm:$0xf0] }
 0x144   :  { %1368 = vmatpush.bf16.msrb.mxu0 %v2271_v62  ;;  %1382 = vmatpush.bf16.msrb.mxu1 %v2335_v0  ;;  %v2111_v62 = vor.u32 %v2560_v60, %v2110_v59  ;;  %v2222_v0 = vld [vmem:[#allocation10 + $0x310] sm:$0xf]  ;;  %v2256_v60 = vld [vmem:[#allocation10 + $0x358] sm:$0xf0] }
 0x145   :  { %v2223_v3 = vor.u32 %v2588_v1, %v2222_v0 }
 0x147   :  { %v2483_v54 = vld [vmem:[#allocation3 + $0xc] sm:$0xf0]  ;;  %v1800_v56 = vld [vmem:[#allocation3 + $0x10] sm:$0xf0] }
 0x148   :  { %v1799_v57 = vor.u32 %v2483_v54, %v1798_v53  ;;  %v1803_v58 = vor.u32 %v2481_v55, %v1800_v56  ;;  %1369 = vmatpush.bf16.msrb.mxu0 %v2263_v4  ;;  %1383 = vmatpush.bf16.msrb.mxu1 %v2327_v6  ;;  %v2183_v53 = vor.u32 %v2578_v50, %v2182_v48  ;;  %v2294_v55 = vld [vmem:[#allocation10 + $0x3a0] sm:$0xf]  ;;  %v2606_v56 = vld [vmem:[#allocation10 + $0x3a4] sm:$0xf0]  ;;  %v2286_v4 = vld [vmem:[#allocation10 + $0x390] sm:$0xf] }
 0x149   :  { %v2287_v7 = vor.u32 %v2604_v5, %v2286_v4  ;;  %v2150_v48 = vld [vmem:[#allocation10 + $0x280] sm:$0xf]  ;;  %v2570_v50 = vld [vmem:[#allocation10 + $0x284] sm:$0xf0]  ;;  %v2565_v5 = vld [vmem:[#allocation10 + $0x264] sm:$0xf] }
 0x14a   :  { %790 = vmatmul.bf16.vlgmr.msra.gmra.mxu2 %v1799_v57  ;;  %804 = vmatmul.bf16.vlgmr.msra.gmra.mxu3 %v1803_v58 }
 0x14b   :  { %1340 = vmatpush.bf16.msra.mxu2 %v2143_v10  ;;  %1354 = vmatpush.bf16.msra.mxu3 %v2207_v14  ;;  %v2166_v10 = vld [vmem:[#allocation10 + $0x2a0] sm:$0xf]  ;;  %v2586_v14 = vld [vmem:[#allocation10 + $0x304] sm:$0xf0] }
 0x14c   :  { %1370 = vmatpush.bf16.msrb.mxu0 %v2255_v15  ;;  %1384 = vmatpush.bf16.msrb.mxu1 %v2319_v18  ;;  %v2167_v16 = vor.u32 %v2574_v12, %v2166_v10  ;;  %v2215_v17 = vor.u32 %v2586_v14, %v2214_v13  ;;  %v2278_v18 = vld [vmem:[#allocation10 + $0x380] sm:$0xf]  ;;  %v2200_v10 = vld [vmem:[#allocation10 + $0x2e8] sm:$0xf0] }
 0x14d   :  { %v2279_v21 = vor.u32 %v2602_v19, %v2278_v18  ;;  %v2203_v13 = vor.u32 %v2581_v8, %v2200_v10  ;;  %v2248_v14 = vld [vmem:[#allocation10 + $0x348] sm:$0xf0]  ;;  %v2288_v8 = vld [vmem:[#allocation10 + $0x398] sm:$0xf0] }
 0x14f   :  { %1341 = vmatpush.bf16.msra.mxu2 %v2135_v22  ;;  %1355 = vmatpush.bf16.msra.mxu3 %v2199_v26  ;;  %v2272_v22 = vld [vmem:[#allocation10 + $0x378] sm:$0xf0] }
 0x150   :  { %1371 = vmatpush.bf16.msrb.mxu0 %v2247_v27  ;;  %1385 = vmatpush.bf16.msrb.mxu1 %v2311_v30  ;;  %v2275_v26 = vor.u32 %v2599_v20, %v2272_v22  ;;  %v2339_v27 = vor.u32 %v2615_v23, %v2336_v24  ;;  %v2158_v30 = vld [vmem:[#allocation10 + $0x290] sm:$0xf]  ;;  %v2563_v22 = vld [vmem:[#allocation10 + $0x254] sm:$0xf]  ;;  %v2128_v23 = vld [vmem:[#allocation10 + $0x258] sm:$0xf0] }
 0x151   :  { %v2159_v36 = vor.u32 %v2572_v35, %v2158_v30  ;;  %v2579_v24 = vld [vmem:[#allocation10 + $0x2d4] sm:$0xf] }
 0x153   :  { %874 = vmatmul.bf16.vlgmr.msra.gmra.mxu0 %v1807_v51  ;;  %888 = vmatmul.bf16.vlgmr.msra.gmra.mxu1 %v1811_v52  ;;  %v2230_v51 = vld [vmem:[#allocation10 + $0x320] sm:$0xf]  ;;  %v2590_v52 = vld [vmem:[#allocation10 + $0x324] sm:$0xf0] }
 0x154   :  { %1342 = vmatpush.bf16.msra.mxu2 %v2127_v34  ;;  %1356 = vmatpush.bf16.msra.mxu3 %v2191_v38  ;;  %v2231_v54 = vor.u32 %v2590_v52, %v2230_v51  ;;  %v2095_v34 = vor.u32 %v2556_v29, %v2094_v28  ;;  %v2264_v38 = vld [vmem:[#allocation10 + $0x368] sm:$0xf0]  ;;  %v2567_v51 = vld [vmem:[#allocation10 + $0x274] sm:$0xf]  ;;  %v2144_v52 = vld [vmem:[#allocation10 + $0x278] sm:$0xf0] }
 0x155   :  { %1372 = vmatpush.bf16.msrb.mxu0 %v2239_v43  ;;  %1386 = vmatpush.bf16.msrb.mxu1 %v2303_v44  ;;  %v2267_v41 = vor.u32 %v2597_v37, %v2264_v38  ;;  %v2331_v44 = vor.u32 %v2613_v39, %v2328_v42  ;;  %v2591_v28 = vld [vmem:[#allocation10 + $0x334] sm:$0xf]  ;;  %v2240_v29 = vld [vmem:[#allocation10 + $0x338] sm:$0xf0]  ;;  %v2120_v37 = vld [vmem:[#allocation10 + $0x248] sm:$0xf0] }
 0x156   :  { %v2577_v38 = vld [vmem:[#allocation10 + $0x2c4] sm:$0xf] }
 0x158   :  { %1343 = vmatpush.bf16.msra.mxu2 %v2119_v49  ;;  %1357 = vmatpush.bf16.msra.mxu3 %v2183_v53  ;;  %v2087_v49 = vor.u32 %v2554_v47, %v2086_v45  ;;  %v2151_v53 = vor.u32 %v2570_v50, %v2150_v48  ;;  %v2589_v45 = vld [vmem:[#allocation10 + $0x324] sm:$0xf]  ;;  %v2232_v47 = vld [vmem:[#allocation10 + $0x328] sm:$0xf0] }
 0x159   :  { %1373 = vmatpush.bf16.msrb.mxu0 %v2231_v54  ;;  %v2147_v54 = vor.u32 %v2567_v51, %v2144_v52  ;;  %v2605_v50 = vld [vmem:[#allocation10 + $0x3a4] sm:$0xf]  ;;  %v2296_v51 = vld [vmem:[#allocation10 + $0x3a8] sm:$0xf0] }
 0x15a   :  { %846 = vmatmul.bf16.vlgmr.msrb.gmra.mxu2 %v1799_v57  ;;  %860 = vmatmul.bf16.vlgmr.msrb.gmra.mxu3 %v1803_v58  ;;  %v2982_v57 = vld [vmem:[#allocation12] sm:$0x3]  ;;  %v2295_v58 = vor.u32 %v2606_v56, %v2294_v55  ;;  %v2583_v55 = vld [vmem:[#allocation10 + $0x2f4] sm:$0xf]  ;;  %v2208_v56 = vld [vmem:[#allocation10 + $0x2f8] sm:$0xf0] }
 0x15b   :  { %v438_v6 = vperm.slane %v2982_v57, 0  ;;  %v2211_v59 = vor.u32 %v2583_v55, %v2208_v56  ;;  %v439_v19 = vperm.slane %v2982_v57, 1  ;;  %v2559_v56 = vld [vmem:[#allocation10 + $0x234] sm:$0xf] }
 0x15c   :  { %1387 = vmatpush.bf16.msrb.mxu1 %v2295_v58  ;;  %1344 = vmatpush.bf16.msra.mxu2 %v2111_v62  ;;  %v2595_v58 = vld [vmem:[#allocation10 + $0x354] sm:$0xf]  ;;  %v2320_v62 = vld [vmem:[#allocation10 + $0x3d8] sm:$0xf0] }
 0x15d   :  { %1358 = vmatpush.bf16.msra.mxu3 %v2175_v2  ;;  %1374 = vmatpush.bf16.msrb.mxu0 %v2223_v3  ;;  %v2259_v1 = vor.u32 %v2595_v58, %v2256_v60  ;;  %v2323_v2 = vor.u32 %v2611_v61, %v2320_v62  ;;  %v2112_v58 = vld [vmem:[#allocation10 + $0x238] sm:$0xf0] }
 0x15e   :  { %v2115_v62 = vor.u32 %v2559_v56, %v2112_v58 }
 0x160   :  { %1388 = vmatpush.bf16.msrb.mxu1 %v2287_v7  ;;  %1345 = vmatpush.bf16.msra.mxu2 %v2103_v11  ;;  %v2136_v7 = vld [vmem:[#allocation10 + $0x268] sm:$0xf0]  ;;  %v2593_v11 = vld [vmem:[#allocation10 + $0x344] sm:$0xf] }
 0x161   :  { %1359 = vmatpush.bf16.msra.mxu3 %v2167_v16  ;;  %1375 = vmatpush.bf16.msrb.mxu0 %v2215_v17  ;;  %v2139_v9 = vor.u32 %v2565_v5, %v2136_v7  ;;  %v2609_v16 = vld [vmem:[#allocation10 + $0x3c4] sm:$0xf]  ;;  %v2312_v17 = vld [vmem:[#allocation10 + $0x3c8] sm:$0xf0]  ;;  %v2251_v20 = vor.u32 %v2593_v11, %v2248_v14  ;;  %v2603_v7 = vld [vmem:[#allocation10 + $0x394] sm:$0xf] }
 0x162   :  { %v2291_v11 = vor.u32 %v2603_v7, %v2288_v8  ;;  %v2573_v14 = vld [vmem:[#allocation10 + $0x2a4] sm:$0xf] }
 0x164   :  { %1389 = vmatpush.bf16.msrb.mxu1 %v2279_v21  ;;  %1346 = vmatpush.bf16.msra.mxu2 %v2095_v34  ;;  %v2315_v21 = vor.u32 %v2609_v16, %v2312_v17  ;;  %v2304_v34 = vld [vmem:[#allocation10 + $0x3b8] sm:$0xf0]  ;;  %v2168_v16 = vld [vmem:[#allocation10 + $0x2a8] sm:$0xf0] }
 0x165   :  { %1424 = vmatpush.bf16.msra.mxu0 %v2275_v26  ;;  %1360 = vmatpush.bf16.msra.mxu3 %v2159_v36  ;;  %v2131_v26 = vor.u32 %v2563_v22, %v2128_v23  ;;  %v2561_v36 = vld [vmem:[#allocation10 + $0x244] sm:$0xf] }
 0x166   :  { %v2601_v22 = vld [vmem:[#allocation10 + $0x384] sm:$0xf] }
 0x168   :  { %1438 = vmatpush.bf16.msra.mxu1 %v2339_v27  ;;  %1347 = vmatpush.bf16.msra.mxu2 %v2087_v49  ;;  %v2192_v27 = vld [vmem:[#allocation10 + $0x2d8] sm:$0xf0]  ;;  %v2235_v49 = vor.u32 %v2589_v45, %v2232_v47  ;;  %v2553_v45 = vld [vmem:[#allocation10 + $0x204] sm:$0xf]  ;;  %v2088_v47 = vld [vmem:[#allocation10 + $0x208] sm:$0xf0] }
 0x169   :  { %1425 = vmatpush.bf16.msra.mxu0 %v2267_v41  ;;  %1361 = vmatpush.bf16.msra.mxu3 %v2151_v53  ;;  %v2195_v30 = vor.u32 %v2579_v24, %v2192_v27  ;;  %v2299_v53 = vor.u32 %v2605_v50, %v2296_v51 }
 0x16c   :  { %1439 = vmatpush.bf16.msra.mxu1 %v2331_v44  ;;  %1396 = vmatpush.bf16.msrb.mxu2 %v2147_v54  ;;  %v2184_v44 = vld [vmem:[#allocation10 + $0x2c8] sm:$0xf0] }
 0x16d   :  { %1410 = vmatpush.bf16.msrb.mxu3 %v2211_v59  ;;  %1426 = vmatpush.bf16.msra.mxu0 %v2259_v1  ;;  %v2575_v59 = vld [vmem:[#allocation10 + $0x2b4] sm:$0xf] }
 0x16e   :  { %v2587_v1 = vld [vmem:[#allocation10 + $0x314] sm:$0xf] }
 0x170   :  { %1440 = vmatpush.bf16.msra.mxu1 %v2323_v2  ;;  %1397 = vmatpush.bf16.msrb.mxu2 %v2139_v9  ;;  %v2224_v2 = vld [vmem:[#allocation10 + $0x318] sm:$0xf0]  ;;  %v2557_v9 = vld [vmem:[#allocation10 + $0x224] sm:$0xf] }
 0x171   :  { %1411 = vmatpush.bf16.msrb.mxu3 %v2203_v13  ;;  %1427 = vmatpush.bf16.msra.mxu0 %v2251_v20  ;;  %v2227_v5 = vor.u32 %v2587_v1, %v2224_v2  ;;  %v2104_v13 = vld [vmem:[#allocation10 + $0x228] sm:$0xf0]  ;;  %v2585_v20 = vld [vmem:[#allocation10 + $0x304] sm:$0xf] }
 0x174   :  { %1441 = vmatpush.bf16.msra.mxu1 %v2315_v21  ;;  %1398 = vmatpush.bf16.msrb.mxu2 %v2131_v26  ;;  %v2216_v21 = vld [vmem:[#allocation10 + $0x308] sm:$0xf0] }
 0x175   :  { %1412 = vmatpush.bf16.msrb.mxu3 %v2195_v30  ;;  %v2219_v27 = vor.u32 %v2585_v20, %v2216_v21 }
 0x1c0   :  { %v2985_v15 = vpop.f32.mrf.mxu0  ;;  %v2987_v25 = vpop.f32.mrf.mxu1 }
 0x1c8   :  { %v2991_v63 = vpop.f32.mrf.mxu0  ;;  %v2995_v12 = vpop.f32.mrf.mxu1 }
 0x1cd   :  { %v791_v31 = vpop.f32.mrf.mxu2  ;;  %v805_v33 = vpop.f32.mrf.mxu3 }
 0x1ce   :  { %v792_v43 = vadd.f32 %v791_v31, %v438_v6  ;;  %v2243_v31 = vor.u32 %v2591_v28, %v2240_v29  ;;  %v2280_v28 = vld [vmem:[#allocation10 + $0x388] sm:$0xf0]  ;;  %v2555_v29 = vld [vmem:[#allocation10 + $0x214] sm:$0xf] }
 0x1d0   :  { %v806_v0 = vadd.f32 %v805_v33, %v792_v43  ;;  %v2607_v33 = vld [vmem:[#allocation10 + $0x3b4] sm:$0xf]  ;;  %v2123_v43 = vor.u32 %v2561_v36, %v2120_v37  ;;  %1428 = vmatpush.bf16.msra.mxu0 %v2243_v31  ;;  %v875_v52 = vpop.f32.mrf.mxu0  ;;  %v889_v55 = vpop.f32.mrf.mxu1  ;;  %v2283_v31 = vor.u32 %v2601_v22, %v2280_v28 }
 0x1d1   :  { %v2307_v35 = vor.u32 %v2607_v33, %v2304_v34  ;;  %v2096_v33 = vld [vmem:[#allocation10 + $0x218] sm:$0xf0]  ;;  %v2571_v34 = vld [vmem:[#allocation10 + $0x294] sm:$0xf] }
 0x1d2   :  { %v820_v18 = vadd.f32 %v2985_v15, %v806_v0  ;;  %1399 = vmatpush.bf16.msrb.mxu2 %v2123_v43  ;;  %v2176_v0 = vld [vmem:[#allocation10 + $0x2b8] sm:$0xf0]  ;;  %v2099_v37 = vor.u32 %v2555_v29, %v2096_v33  ;;  %v2382_v22 = vld [vmem:[#allocation13 + $0x50] sm:$0xf]  ;;  %v2374_v29 = vld [vmem:[#allocation13 + $0x40] sm:$0xf] }
 0x1d3   :  { %1442 = vmatpush.bf16.msra.mxu1 %v2307_v35 }
 0x1d4   :  { %v3000_v15 = vadd.f32 %v2987_v25, %v820_v18  ;;  %v2187_v25 = vor.u32 %v2577_v38, %v2184_v44  ;;  %1429 = vmatpush.bf16.msra.mxu0 %v2235_v49  ;;  %v2171_v18 = vor.u32 %v2573_v14, %v2168_v16  ;;  %v2152_v49 = vld [vmem:[#allocation10 + $0x288] sm:$0xf0]  ;;  %v2390_v14 = vld [vmem:[#allocation13 + $0x60] sm:$0xf] }
 0x1d5   :  { %v793_v3 = vpop.f32.mrf.mxu2  ;;  %v2993_v4 = vpop.f32.mrf.mxu3  ;;  %v2630_v16 = vld [vmem:[#allocation13 + $0x64] sm:$0xf0] }
 0x1d6   :  { %v794_v39 = vadd.f32 %v793_v3, %v438_v6  ;;  %v894_v6 = vmax.f32 %v3000_v15, 0.0  ;;  %1413 = vmatpush.bf16.msrb.mxu3 %v2187_v25  ;;  %v2179_v3 = vor.u32 %v2575_v59, %v2176_v0  ;;  %1400 = vmatpush.bf16.msrb.mxu2 %v2115_v62  ;;  %v2160_v15 = vld [vmem:[#allocation10 + $0x298] sm:$0xf0]  ;;  %v2569_v25 = vld [vmem:[#allocation10 + $0x284] sm:$0xf]  ;;  %v2391_v20 = vor.u32 %v2630_v16, %v2390_v14 }
 0x1d7   :  { %1443 = vmatpush.bf16.msra.mxu1 %v2299_v53  ;;  %v2440_v14 = vld [vmem:[#allocation13 + $0xc8] sm:$0xf0] }
 0x1d8   :  { %v808_v60 = vadd.f32 %v2993_v4, %v794_v39  ;;  %v2107_v4 = vor.u32 %v2557_v9, %v2104_v13  ;;  %1430 = vmatpush.bf16.msra.mxu0 %v2227_v5  ;;  %v877_v38 = vpop.f32.mrf.mxu0  ;;  %v2400_v13 = vld [vmem:[#allocation13 + $0x78] sm:$0xf0] }
 0x1da   :  { %1414 = vmatpush.bf16.msrb.mxu3 %v2179_v3  ;;  %v822_v23 = vadd.f32 %v2991_v63, %v808_v60  ;;  %1401 = vmatpush.bf16.msrb.mxu2 %v2107_v4  ;;  %v2163_v63 = vor.u32 %v2571_v34, %v2160_v15  ;;  %v2629_v4 = vld [vmem:[#allocation13 + $0x64] sm:$0xf]  ;;  %v2376_v34 = vld [vmem:[#allocation13 + $0x48] sm:$0xf0] }
 0x1db   :  { %1444 = vmatpush.bf16.msra.mxu1 %v2291_v11 }
 0x1dc   :  { %v836_v57 = vadd.f32 %v2995_v12, %v822_v23  ;;  %1431 = vmatpush.bf16.msra.mxu0 %v2219_v27  ;;  %v2155_v12 = vor.u32 %v2569_v25, %v2152_v49  ;;  %v2628_v23 = vld [vmem:[#allocation13 + $0x54] sm:$0xf0]  ;;  %v2384_v27 = vld [vmem:[#allocation13 + $0x58] sm:$0xf0]  ;;  %v2646_v49 = vld [vmem:[#allocation13 + $0xe4] sm:$0xf0] }
 0x1dd   :  { %v847_v41 = vpop.f32.mrf.mxu2  ;;  %v861_v42 = vpop.f32.mrf.mxu3 }
 0x1de   :  { %v848_v48 = vadd.f32 %v847_v41, %v439_v19  ;;  %1415 = vmatpush.bf16.msrb.mxu3 %v2171_v18  ;;  %v891_v41 = vpop.f32.mrf.mxu1  ;;  %1402 = vmatpush.bf16.msrb.mxu2 %v2099_v37  ;;  %v896_v50 = vmax.f32 %v836_v57, 0.0  ;;  %v2392_v18 = vld [vmem:[#allocation13 + $0x68] sm:$0xf0]  ;;  %v2462_v37 = vld [vmem:[#allocation13 + $0xf0] sm:$0xf] }
 0x1df   :  { %1445 = vmatpush.bf16.msra.mxu1 %v2283_v31  ;;  %v2395_v21 = vor.u32 %v2629_v4, %v2392_v18  ;;  %v2625_v31 = vld [vmem:[#allocation13 + $0x44] sm:$0xf]  ;;  %v2623_v57 = vld [vmem:[#allocation13 + $0x34] sm:$0xf]  ;;  %v2430_v4 = vld [vmem:[#allocation13 + $0xb0] sm:$0xf] }
 0x1e0   :  { %v862_v54 = vadd.f32 %v861_v42, %v848_v48  ;;  %v2091_v48 = vor.u32 %v2553_v45, %v2088_v47  ;;  %v2379_v15 = vor.u32 %v2625_v31, %v2376_v34  ;;  %v2358_v45 = vld [vmem:[#allocation13 + $0x20] sm:$0xf]  ;;  %v2622_v47 = vld [vmem:[#allocation13 + $0x24] sm:$0xf0]  ;;  %v2640_v18 = vld [vmem:[#allocation13 + $0xb4] sm:$0xf0] }
 0x1e1   :  { %v2359_v25 = vor.u32 %v2622_v47, %v2358_v45  ;;  %v994_v31 = vld [vmem:[#allocation12 + $0x2] sm:$0x3]  ;;  %v2636_v34 = vld [vmem:[#allocation13 + $0x94] sm:$0xf0]  ;;  %v2408_v45 = vld [vmem:[#allocation13 + $0x88] sm:$0xf0] }
 0x1e2   :  { %v876_v61 = vadd.f32 %v875_v52, %v862_v54  ;;  %1416 = vmatpush.bf16.msrb.mxu3 %v2163_v63  ;;  %1403 = vmatpush.bf16.msrb.mxu2 %v2091_v48  ;;  %v2648_v63 = vld [vmem:[#allocation13 + $0xf4] sm:$0xf0]  ;;  %v2454_v48 = vld [vmem:[#allocation13 + $0xe0] sm:$0xf] }
 0x1e4   :  { %v890_v10 = vadd.f32 %v889_v55, %v876_v61 }
 0x1e5   :  { %v849_v17 = vpop.f32.mrf.mxu2  ;;  %v863_v30 = vpop.f32.mrf.mxu3 }
 0x1e6   :  { %v895_v24 = vmax.f32 %v890_v10, 0.0  ;;  %v850_v26 = vadd.f32 %v849_v17, %v439_v19  ;;  %1417 = vmatpush.bf16.msrb.mxu3 %v2155_v12  ;;  %v2631_v10 = vld [vmem:[#allocation13 + $0x74] sm:$0xf] }
 0x1e7   :  { %v2403_v17 = vor.u32 %v2631_v10, %v2400_v13  ;;  %v2641_v13 = vld [vmem:[#allocation13 + $0xc4] sm:$0xf] }
 0x1e8   :  { %v898_v35 = vpack.c.bf16 %v895_v24, %v894_v6  ;;  %v864_v36 = vadd.f32 %v863_v30, %v850_v26  ;;  %v2627_v24 = vld [vmem:[#allocation13 + $0x54] sm:$0xf]  ;;  %v2383_v26 = vor.u32 %v2628_v23, %v2382_v22  ;;  %v2626_v30 = vld [vmem:[#allocation13 + $0x44] sm:$0xf0]  ;;  %v2432_v22 = vld [vmem:[#allocation13 + $0xb8] sm:$0xf0] }
 0x1e9   :  { %v2387_v28 = vor.u32 %v2627_v24, %v2384_v27  ;;  %v2375_v33 = vor.u32 %v2626_v30, %v2374_v29  ;;  %v2422_v24 = vld [vmem:[#allocation13 + $0xa0] sm:$0xf]  ;;  %v2637_v27 = vld [vmem:[#allocation13 + $0xa4] sm:$0xf]  ;;  %v2424_v29 = vld [vmem:[#allocation13 + $0xa8] sm:$0xf0] }
 0x1ea   :  { %v901_v19 = vshrl.u32 %v898_v35, 16  ;;  %911 = vst [vmem:[#allocation3 + $0x8] sm:$0xff] %v898_v35  ;;  %v878_v39 = vadd.f32 %v877_v38, %v864_v36  ;;  %v904_v43 = vshll.u32 %v898_v35, 16  ;;  %v2366_v35 = vld [vmem:[#allocation13 + $0x30] sm:$0xf]  ;;  %v2427_v30 = vor.u32 %v2637_v27, %v2424_v29 }
 0x1eb   :  { %v2624_v36 = vld [vmem:[#allocation13 + $0x34] sm:$0xf0] }
 0x1ec   :  { %v903_v42 = vrot.slane %v901_v19, 7  ;;  %v892_v44 = vadd.f32 %v891_v41, %v878_v39  ;;  %v2367_v38 = vor.u32 %v2624_v36, %v2366_v35  ;;  %v2368_v19 = vld [vmem:[#allocation13 + $0x38] sm:$0xf0]  ;;  %v2463_v39 = vor.u32 %v2648_v63, %v2462_v37 }
 0x1ed   :  { %v2371_v41 = vor.u32 %v2623_v57, %v2368_v19  ;;  %v2416_v36 = vld [vmem:[#allocation13 + $0x98] sm:$0xf0]  ;;  %v2406_v19 = vld [vmem:[#allocation13 + $0x80] sm:$0xf] }
 0x1ee   :  { %v906_v51 = vor.u32 %v904_v43, %v903_v42  ;;  %v897_v52 = vmax.f32 %v892_v44, 0.0  ;;  %v2647_v42 = vld [vmem:[#allocation13 + $0xf4] sm:$0xf]  ;;  %v2464_v43 = vld [vmem:[#allocation13 + $0xf8] sm:$0xf0] }
 0x1ef   :  { %v2467_v44 = vor.u32 %v2647_v42, %v2464_v43 }
 0x1f0   :  { %v909_v53 = vsel %vm2968_vm15, %v906_v51, %v2974_v40  ;;  %v899_v6 = vpack.c.bf16 %v897_v52, %v896_v50  ;;  %v2621_v50 = vld [vmem:[#allocation13 + $0x24] sm:$0xf]  ;;  %v2360_v51 = vld [vmem:[#allocation13 + $0x28] sm:$0xf0]  ;;  %v2455_v52 = vor.u32 %v2646_v49, %v2454_v48 }
 0x1f1   :  { %910 = vst [vmem:[#allocation3] sm:$0xff] %v909_v53  ;;  %v2078_v60 = vld [vmem:[#allocation3 + $0x8] sm:$0xf]  ;;  %v2550_v61 = vld [vmem:[#allocation3 + $0xc] sm:$0xf]  ;;  %v2363_v12 = vor.u32 %v2621_v50, %v2360_v51 }
 0x1f2   :  { %v913_v54 = vshrl.u32 %v899_v6, 16  ;;  %923 = vst [vmem:[#allocation3 + $0x18] sm:$0xff] %v899_v6  ;;  %v916_v56 = vshll.u32 %v899_v6, 16  ;;  %v2645_v53 = vld [vmem:[#allocation13 + $0xe4] sm:$0xf] }
 0x1f3   :  { %v2456_v6 = vld [vmem:[#allocation13 + $0xe8] sm:$0xf0] }
 0x1f4   :  { %v915_v55 = vrot.slane %v913_v54, 7  ;;  %v2459_v54 = vor.u32 %v2645_v53, %v2456_v6 }
 0x1f6   :  { %v918_v58 = vor.u32 %v916_v56, %v915_v55  ;;  %v2350_v55 = vld [vmem:[#allocation13 + $0x10] sm:$0xf]  ;;  %v2620_v56 = vld [vmem:[#allocation13 + $0x14] sm:$0xf0] }
 0x1f8   :  { %v921_v59 = vsel %vm2968_vm15, %v918_v58, %v2979_v46  ;;  %v2070_v2 = vld [vmem:[#allocation3] sm:$0xf]  ;;  %v2549_v5 = vld [vmem:[#allocation3 + $0x4] sm:$0xf] }
 0x1f9   :  { %922 = vst [vmem:[#allocation3 + $0x10] sm:$0xff] %v921_v59  ;;  %v2552_v62 = vld [vmem:[#allocation3 + $0x14] sm:$0xf0]  ;;  %v2080_v0 = vld [vmem:[#allocation3 + $0x18] sm:$0xf0]  ;;  %v2351_v59 = vor.u32 %v2620_v56, %v2350_v55  ;;  %v997_v56 = vperm.slane %v994_v31, 1 }
 0x1fa   :  { %v2079_v1 = vor.u32 %v2552_v62, %v2078_v60  ;;  %v2083_v40 = vor.u32 %v2550_v61, %v2080_v0  ;;  %v2632_v46 = vld [vmem:[#allocation13 + $0x74] sm:$0xf0]  ;;  %v2446_v58 = vld [vmem:[#allocation13 + $0xd0] sm:$0xf]  ;;  %v2619_v61 = vld [vmem:[#allocation13 + $0x14] sm:$0xf] }
 0x1fb   :  { %v2399_v11 = vor.u32 %v2632_v46, %v2398_v32  ;;  %v2644_v60 = vld [vmem:[#allocation13 + $0xd4] sm:$0xf0]  ;;  %v2352_v62 = vld [vmem:[#allocation13 + $0x18] sm:$0xf0]  ;;  %v2642_v32 = vld [vmem:[#allocation13 + $0xc4] sm:$0xf0] }
 0x1fc   :  { %1376 = vmatmul.bf16.vlgmr.msrb.gmra.mxu0 %v2079_v1  ;;  %1390 = vmatmul.bf16.vlgmr.msrb.gmra.mxu1 %v2083_v40  ;;  %v2447_v0 = vor.u32 %v2644_v60, %v2446_v58  ;;  %v2617_v46 = vld [vmem:[#allocation13 + $0x4] sm:$0xf] }
 0x1fd   :  { %1684 = vmatpush.bf16.msrb.mxu0 %v2403_v17  ;;  %1698 = vmatpush.bf16.msrb.mxu1 %v2467_v44  ;;  %v2443_v17 = vor.u32 %v2641_v13, %v2440_v14 }
 0x200   :  { %v2551_v3 = vld [vmem:[#allocation3 + $0xc] sm:$0xf0]  ;;  %v2072_v7 = vld [vmem:[#allocation3 + $0x10] sm:$0xf0] }
 0x201   :  { %v2071_v8 = vor.u32 %v2551_v3, %v2070_v2  ;;  %v2075_v9 = vor.u32 %v2549_v5, %v2072_v7  ;;  %1685 = vmatpush.bf16.msrb.mxu0 %v2395_v21  ;;  %1699 = vmatpush.bf16.msrb.mxu1 %v2459_v54  ;;  %v2448_v2 = vld [vmem:[#allocation13 + $0xd8] sm:$0xf0]  ;;  %v2342_v5 = vld [vmem:[#allocation13] sm:$0xf]  ;;  %v2618_v7 = vld [vmem:[#allocation13 + $0x4] sm:$0xf0]  ;;  %v2431_v21 = vor.u32 %v2640_v18, %v2430_v4 }
 0x202   :  { %v1490_v18 = vld [vmem:[%s3030_s6] sm:$0x3]  ;;  %s2862_s6 = smov [#allocation15]  }
 0x203   :  { %1348 = vmatmul.bf16.vlgmr.msra.gmra.mxu2 %v2071_v8  ;;  %1362 = vmatmul.bf16.vlgmr.msra.gmra.mxu3 %v2075_v9  ;;  %s1724_s13 = sshll.u32 %s2862_s6, 4  ;;  %s1725_s13 = int_to_ptr.vmem [resolvable:$true] %s1724_s13 }
 0x204   :  { %1656 = vmatpush.bf16.msra.mxu2 %v2399_v11  ;;  %1670 = vmatpush.bf16.msra.mxu3 %v2463_v39  ;;  %v2344_v11 = vld [vmem:[#allocation13 + $0x8] sm:$0xf0]  ;;  %v2634_v39 = vld [vmem:[#allocation13 + $0x84] sm:$0xf0] }
 0x205   :  { %1686 = vmatpush.bf16.msrb.mxu0 %v2387_v28  ;;  %v2347_v16 = vor.u32 %v2617_v46, %v2344_v11  ;;  %v2407_v44 = vor.u32 %v2634_v39, %v2406_v19 }
 0x208   :  { %1657 = vmatpush.bf16.msra.mxu2 %v2391_v20  ;;  %1671 = vmatpush.bf16.msra.mxu3 %v2455_v52  ;;  %v2639_v20 = vld [vmem:[#allocation13 + $0xb4] sm:$0xf] }
 0x209   :  { %1687 = vmatpush.bf16.msrb.mxu0 %v2379_v15  ;;  %v2435_v23 = vor.u32 %v2639_v20, %v2432_v22  ;;  %v2635_v15 = vld [vmem:[#allocation13 + $0x94] sm:$0xf] }
 0x20a   :  { %v2419_v63 = vor.u32 %v2635_v15, %v2416_v36 }
 0x20c   :  { %1432 = vmatmul.bf16.vlgmr.msra.gmra.mxu0 %v2079_v1  ;;  %1446 = vmatmul.bf16.vlgmr.msra.gmra.mxu1 %v2083_v40  ;;  %v2355_v1 = vor.u32 %v2619_v61, %v2352_v62  ;;  %v2643_v40 = vld [vmem:[#allocation13 + $0xd4] sm:$0xf] }
 0x20d   :  { %1658 = vmatpush.bf16.msra.mxu2 %v2383_v26  ;;  %1688 = vmatpush.bf16.msrb.mxu0 %v2371_v41  ;;  %v2451_v3 = vor.u32 %v2643_v40, %v2448_v2  ;;  %v2638_v26 = vld [vmem:[#allocation13 + $0xa4] sm:$0xf0]  ;;  %v2633_v41 = vld [vmem:[#allocation13 + $0x84] sm:$0xf] }
 0x20e   :  { %1672 = vmatpush.bf16.msra.mxu3 %v2447_v0  ;;  %v2423_v28 = vor.u32 %v2638_v26, %v2422_v24  ;;  %v2411_v48 = vor.u32 %v2633_v41, %v2408_v45  ;;  %v1492_v26 = vperm.slane %v1490_v18, 0 }
 0x20f   :  { %1700 = vmatpush.bf16.msrb.mxu1 %v2451_v3 }
 0x211   :  { %1659 = vmatpush.bf16.msra.mxu2 %v2375_v33  ;;  %1689 = vmatpush.bf16.msrb.mxu0 %v2363_v12  ;;  %v2414_v33 = vld [vmem:[#allocation13 + $0x90] sm:$0xf] }
 0x212   :  { %v2415_v35 = vor.u32 %v2636_v34, %v2414_v33 }
 0x213   :  { %1404 = vmatmul.bf16.vlgmr.msrb.gmra.mxu2 %v2071_v8  ;;  %1418 = vmatmul.bf16.vlgmr.msrb.gmra.mxu3 %v2075_v9  ;;  %v2343_v8 = vor.u32 %v2618_v7, %v2342_v5  ;;  %v2438_v9 = vld [vmem:[#allocation13 + $0xc0] sm:$0xf] }
 0x214   :  { %v2439_v10 = vor.u32 %v2642_v32, %v2438_v9  ;;  %1701 = vmatpush.bf16.msrb.mxu1 %v2443_v17 }
 0x215   :  { %1660 = vmatpush.bf16.msra.mxu2 %v2367_v38  ;;  %1690 = vmatpush.bf16.msrb.mxu0 %v2355_v1  ;;  %v996_v38 = vperm.slane %v994_v31, 0 }
 0x216   :  { %1673 = vmatpush.bf16.msra.mxu3 %v2439_v10 }
 0x218   :  { %1702 = vmatpush.bf16.msrb.mxu1 %v2435_v23 }
 0x219   :  { %1661 = vmatpush.bf16.msra.mxu2 %v2359_v25  ;;  %1691 = vmatpush.bf16.msrb.mxu0 %v2347_v16 }
 0x21a   :  { %1674 = vmatpush.bf16.msra.mxu3 %v2431_v21  ;;  %v1493_v21 = vperm.slane %v1490_v18, 1 }
 0x21c   :  { %1703 = vmatpush.bf16.msrb.mxu1 %v2427_v30 }
 0x21d   :  { %1662 = vmatpush.bf16.msra.mxu2 %v2351_v59 }
 0x21e   :  { %1675 = vmatpush.bf16.msra.mxu3 %v2423_v28 }
 0x220   :  { %1704 = vmatpush.bf16.msrb.mxu1 %v2419_v63 }
 0x221   :  { %1663 = vmatpush.bf16.msra.mxu2 %v2343_v8 }
 0x222   :  { %1676 = vmatpush.bf16.msra.mxu3 %v2415_v35 }
 0x224   :  { %1705 = vmatpush.bf16.msrb.mxu1 %v2411_v48 }
 0x226   :  { %1677 = vmatpush.bf16.msra.mxu3 %v2407_v44 }
 0x279   :  { %v1377_v37 = vpop.f32.mrf.mxu0  ;;  %v1391_v57 = vpop.f32.mrf.mxu1 }
 0x281   :  { %v1379_v49 = vpop.f32.mrf.mxu0  ;;  %v1393_v53 = vpop.f32.mrf.mxu1 }
 0x286   :  { %v1349_v42 = vpop.f32.mrf.mxu2  ;;  %v1363_v43 = vpop.f32.mrf.mxu3 }
 0x287   :  { %v1350_v47 = vadd.f32 %v1349_v42, %v996_v38 }
 0x289   :  { %v1364_v25 = vadd.f32 %v1363_v43, %v1350_v47  ;;  %v1433_v1 = vpop.f32.mrf.mxu0  ;;  %v1447_v2 = vpop.f32.mrf.mxu1 }
 0x28b   :  { %v1378_v52 = vadd.f32 %v1377_v37, %v1364_v25 }
 0x28d   :  { %v1392_v54 = vadd.f32 %v1391_v57, %v1378_v52 }
 0x28e   :  { %v1351_v50 = vpop.f32.mrf.mxu2  ;;  %v1365_v51 = vpop.f32.mrf.mxu3 }
 0x28f   :  { %v1352_v12 = vadd.f32 %v1351_v50, %v996_v38  ;;  %v1452_v61 = vmax.f32 %v1392_v54, 0.0 }
 0x291   :  { %v1366_v6 = vadd.f32 %v1365_v51, %v1352_v12  ;;  %v1435_v46 = vpop.f32.mrf.mxu0  ;;  %v1449_v13 = vpop.f32.mrf.mxu1 }
 0x293   :  { %v1380_v55 = vadd.f32 %v1379_v49, %v1366_v6 }
 0x295   :  { %v1394_v58 = vadd.f32 %v1393_v53, %v1380_v55 }
 0x296   :  { %v1405_v59 = vpop.f32.mrf.mxu2  ;;  %v1419_v60 = vpop.f32.mrf.mxu3 }
 0x297   :  { %v1454_v62 = vmax.f32 %v1394_v58, 0.0  ;;  %v1406_v0 = vadd.f32 %v1405_v59, %v997_v56 }
 0x299   :  { %v1456_v40 = vpack.c.bf16 %v1454_v62, %v1452_v61  ;;  %v1420_v3 = vadd.f32 %v1419_v60, %v1406_v0 }
 0x29b   :  { %1664 = vmatmul.bf16.vlgmr.msra.gmra.mxu2 %v1456_v40  ;;  %1692 = vmatmul.bf16.vlgmr.msrb.gmra.mxu0 %v1456_v40  ;;  %v1434_v7 = vadd.f32 %v1433_v1, %v1420_v3 }
 0x29d   :  { %v1448_v10 = vadd.f32 %v1447_v2, %v1434_v7 }
 0x29e   :  { %v1407_v5 = vpop.f32.mrf.mxu2  ;;  %v1421_v9 = vpop.f32.mrf.mxu3 }
 0x29f   :  { %v1408_v8 = vadd.f32 %v1407_v5, %v997_v56  ;;  %v1453_v16 = vmax.f32 %v1448_v10, 0.0 }
 0x2a1   :  { %v1422_v32 = vadd.f32 %v1421_v9, %v1408_v8 }
 0x2a3   :  { %v1436_v11 = vadd.f32 %v1435_v46, %v1422_v32 }
 0x2a5   :  { %v1450_v14 = vadd.f32 %v1449_v13, %v1436_v11 }
 0x2a7   :  { %v1455_v17 = vmax.f32 %v1450_v14, 0.0 }
 0x2a9   :  { %v1457_v4 = vpack.c.bf16 %v1455_v17, %v1453_v16 }
 0x2ab   :  { %1678 = vmatmul.bf16.vlgmr.msra.gmra.mxu3 %v1457_v4  ;;  %1706 = vmatmul.bf16.vlgmr.msrb.gmra.mxu1 %v1457_v4 }
 0x318   :  { %v1693_v20 = vpop.f32.mrf.mxu0 }
 0x319   :  { %v1694_v22 = vadd.f32 %v1693_v20, %v1493_v21 }
 0x31e   :  { %v1665_v23 = vpop.f32.mrf.mxu2 }
 0x31f   :  { %v1666_v30 = vadd.f32 %v1665_v23, %v1492_v26 }
 0x320   :  { %v1695_v29 = vpop.f32.mrf.mxu0 }
 0x321   :  { %v1696_v33 = vadd.f32 %v1695_v29, %v1493_v21 }
 0x326   :  { %v1667_v37 = vpop.f32.mrf.mxu2 }
 0x327   :  { %v1668_v63 = vadd.f32 %v1667_v37, %v1492_v26 }
 0x328   :  { %v1707_v24 = vpop.f32.mrf.mxu1 }
 0x329   :  { %v1708_v27 = vadd.f32 %v1707_v24, %v1694_v22 }
 0x32b   :  { %v1713_v28 = vmax.f32 %v1708_v27, 0.0 }
 0x32d   :  { %1717 = vst [vmem:[#allocation15 + $0x8] sm:$0xff] %v1713_v28 }
 0x32e   :  { %v1679_v31 = vpop.f32.mrf.mxu3 }
 0x32f   :  { %v1680_v34 = vadd.f32 %v1679_v31, %v1666_v30 }
 0x330   :  { %v1709_v15 = vpop.f32.mrf.mxu1 }
 0x331   :  { %v1712_v35 = vmax.f32 %v1680_v34, 0.0  ;;  %v1710_v36 = vadd.f32 %v1709_v15, %v1696_v33 }
 0x333   :  { %1716 = vst [vmem:[#allocation15] sm:$0xff] %v1712_v35  ;;  %v1715_v38 = vmax.f32 %v1710_v36, 0.0 }
 0x335   :  { %1719 = vst [vmem:[#allocation15 + $0x18] sm:$0xff] %v1715_v38 }
 0x336   :  { %v1681_v57 = vpop.f32.mrf.mxu3 }
 0x337   :  { %v1682_v19 = vadd.f32 %v1681_v57, %v1668_v63 }
 0x339   :  { %v1714_v39 = vmax.f32 %v1682_v19, 0.0 }
 0x33b   :  { %1718 = vst [vmem:[#allocation15 + $0x10] sm:$0xff] %v1714_v39 }
 0x33c   :  { %1732 = dma.vmem_to_hbm [thread:$0]  %s1725_s13, 512, %s1727_s3, [#allocation6], %s2863_s15, %s2863_s15, %s2864_s16  }
 0x33d   :  { %2844 = dma.done.wait [#allocation6], 512  }
 0x33e   :  { %2845 = vsyncadd [#allocation6], 4294966784 }
 0x33f   :  { %1737 = vsyncpa [#allocation5], 1 }
 0x340   :  { %1738 = vsyncpa [#allocation8], 1 }
 0x341   :  { %1739 = vsyncpa [#allocation11], 1 }
 0x342   :  { %1740 = vsyncpa [#allocation14], 1 }
 0x343   :  { %1741 = vsyncpa [#allocation6], 1 }

</bundles_post_ra>
